<compile_context>
chip_gen: v6e
topology: v6e:2x2x1
jax: 0.10.0
libtpu: 0.0.40
codegen_flags: <defaults>
</compile_context>

<pallas_src>
import functools

import numpy as np
import jax
import jax.numpy as jnp
from jax.experimental import pallas as pl
from jax.experimental.pallas import tpu as pltpu

GAMMA = 2.0   # focal_loss2 default gamma (hard-coded as squared term below)
ALPHA = 0.25  # focal_loss2 default alpha


def _round_up(x, m):
    return ((x + m - 1) // m) * m


def _kl_focal_kernel(loc_ref, cls_p_ref, cls_t_ref, out_ref,
                     acc_loc, acc_cls, acc_pos, *, tile, num_rows):
    c = pl.program_id(0)            # parallel ("core") axis
    j = pl.program_id(1)            # reduction axis
    nj = pl.num_programs(1)

    # Reset the resident per-core accumulators at the start of each core sweep.
    @pl.when(j == 0)
    def _():
        acc_loc[...] = jnp.zeros_like(acc_loc)
        acc_cls[...] = jnp.zeros_like(acc_cls)
        acc_pos[...] = jnp.zeros_like(acc_pos)

    # In-kernel tail mask (replaces jnp.pad + a `valid` input stream).
    # Uses the UNCLAMPED block index so fully out-of-range steps (whose DMA
    # index is clamped in the index_map and re-fetch a valid block) contribute
    # exactly zero and never double-count.
    row_start = (c * nj + j) * tile
    row = jax.lax.broadcasted_iota(jnp.int32, (tile, 1), 0) + row_start
    row_valid = row < num_rows                                   # (tile, 1) bool

    cls_t = cls_t_ref[...]                                       # (tile, 1) i32
    pos = jnp.logical_and(cls_t != 0, row_valid)                 # (tile, 1) bool

    # ---- localization KL loss: exp(-log_var) * smooth_l1 + log_var/2, pos only ----
    loc_all = loc_ref[...].astype(jnp.float32)                   # (tile, 12)
    loc_p = loc_all[:, 0:4]
    log_var = loc_all[:, 4:8]
    loc_t = loc_all[:, 8:12]
    d = jnp.abs(loc_t - loc_p)
    sl1 = jnp.where(d < 1.0, 0.5 * d * d, d - 0.5)
    kl = jnp.exp(-log_var) * sl1 + 0.5 * log_var
    acc_loc[...] += jnp.where(pos, kl, 0.0)                      # select, not mul (NaN-safe)

    # ---- sigmoid focal loss over all valid anchors, one-hot target on the fly ----
    x = cls_p_ref[...].astype(jnp.float32)                       # (tile, C)
    col = jax.lax.broadcasted_iota(jnp.int32, x.shape, 1)
    t = jnp.where(col == cls_t, 1.0, 0.0)                        # one_hot(cls_t, C)
    e = jnp.exp(-jnp.abs(x))                                     # single EUP exp, reused
    r = pl.reciprocal(1.0 + e, approx=True)
    p = jnp.where(x >= 0, r, e * r)                              # sigmoid(x)
    ce = jnp.maximum(x, 0.0) - x * t + jnp.log1p(e)              # stable BCE-with-logits
    one_m_pt = jnp.abs(t - p)                                    # == 1 - pt for t in {0,1}
    w = ALPHA * t + (1.0 - ALPHA) * (1.0 - t)
    fl = w * one_m_pt * one_m_pt * ce                            # gamma = 2
    acc_cls[...] += jnp.where(row_valid, fl, 0.0)

    # ---- positive-anchor count ----
    acc_pos[...] += jnp.where(pos, 1.0, 0.0)

    # Cross-lane reduction + lane-dense (8,128) store once per core, last step.
    @pl.when(j == nj - 1)
    def _():
        loc_sum = jnp.sum(acc_loc[...])
        cls_sum = jnp.sum(acc_cls[...])
        npos = jnp.sum(acc_pos[...])
        lane = jax.lax.broadcasted_iota(jnp.int32, (1, 8, 128), 2)
        out_ref[...] = (jnp.where(lane == 0, loc_sum, 0.0)
                        + jnp.where(lane == 1, cls_sum, 0.0)
                        + jnp.where(lane == 2, npos, 0.0))


def kl_focal_loss(loc_p, cls_p, log_var_p, loc_t, cls_t, ignore=None, *,
                  tile=1024, num_cores=2):
    """JAX wrapper. loc_p/log_var_p/loc_t: (..., 4); cls_p: (..., C); cls_t: (...).

    Inputs may be f32 or bf16; bf16 is fed to the kernel as-is (half the HBM
    traffic) and upcast in-kernel.
    """
    assert ignore is None, "TODO(synk): ignore-mask branch not implemented"
    C = cls_p.shape[-1]
    M = int(np.prod(cls_t.shape))

    # Single (M, 12) stream for the three narrow loc tensors (no padding, no
    # f32 upcast in the wrapper).
    loc_dtype = jnp.result_type(loc_p.dtype, log_var_p.dtype, loc_t.dtype)
    loc_all = jnp.concatenate(
        [loc_p.reshape(M, 4).astype(loc_dtype),
         log_var_p.reshape(M, 4).astype(loc_dtype),
         loc_t.reshape(M, 4).astype(loc_dtype)], axis=-1)        # (M, 12)
    cls_p2 = cls_p.reshape(M, C)
    cls_t2 = cls_t.reshape(M, 1).astype(jnp.int32)

    # Row tile: multiple of 8, no larger than the (rounded-up) row count.
    # For very large C on v7x (64 MiB VMEM), lower `tile` or set
    # pltpu.CompilerParams(vmem_limit_bytes=...).
    tile = max(8, _round_up(min(tile, _round_up(M, 8)), 8))
    n_tiles = pl.cdiv(M, tile)
    num_cores = max(1, min(num_cores, n_tiles))
    n_steps = pl.cdiv(n_tiles, num_cores)

    def row_map(c, j):
        # Clamp so trailing (fully out-of-range) steps re-fetch a valid block;
        # the kernel masks their rows to zero anyway.
        return (jnp.minimum(c * n_steps + j, n_tiles - 1), 0)

    kernel = functools.partial(_kl_focal_kernel, tile=tile, num_rows=M)

    out = pl.pallas_call(
        kernel,
        out_shape=jax.ShapeDtypeStruct((num_cores, 8, 128), jnp.float32),
        grid_spec=pltpu.PrefetchScalarGridSpec(
            num_scalar_prefetch=0,
            grid=(num_cores, n_steps),
            in_specs=[pl.BlockSpec((tile, 12), row_map),
                      pl.BlockSpec((tile, C), row_map),
                      pl.BlockSpec((tile, 1), row_map)],
            out_specs=pl.BlockSpec((1, 8, 128), lambda c, j: (c, 0, 0)),
            scratch_shapes=[pltpu.VMEM((tile, 4), jnp.float32),
                            pltpu.VMEM((tile, C), jnp.float32),
                            pltpu.VMEM((tile, 1), jnp.float32)]),
        compiler_params=pltpu.CompilerParams(
            dimension_semantics=("parallel", "arbitrary")),
    )(loc_all, cls_p2, cls_t2)

    sums = jnp.sum(out[:, 0, :], axis=0)          # reduce per-core partials
    loc_sum, cls_sum, num_pos = sums[0], sums[1], sums[2]
    loss = jnp.where(num_pos > 0.0,
                     (loc_sum + cls_sum) / jnp.maximum(num_pos, 1.0),
                     jnp.float32(0.0))
    return loss


def _reference(loc_p, cls_p, log_var_p, loc_t, cls_t):
    """Pure-JAX reference of the same math (exact sigmoid)."""
    pos = (cls_t != 0).astype(jnp.float32)
    num_pos = pos.sum()
    d = jnp.abs(loc_t - loc_p)
    sl1 = jnp.where(d < 1.0, 0.5 * d * d, d - 0.5)
    loc_l = jnp.sum((jnp.exp(-log_var_p) * sl1 + 0.5 * log_var_p)
                    * pos[..., None]) / num_pos
    C = cls_p.shape[-1]
    t = jax.nn.one_hot(cls_t, C, dtype=jnp.float32)
    p = jax.nn.sigmoid(cls_p)
    ce = jnp.maximum(cls_p, 0.0) - cls_p * t + jnp.log1p(jnp.exp(-jnp.abs(cls_p)))
    pt = p * t + (1 - p) * (1 - t)
    w = ALPHA * t + (1 - ALPHA) * (1 - t)
    cls_l = jnp.sum(w * (1 - pt) ** 2 * ce) / num_pos
    return loc_l + cls_l


if __name__ == "__main__":
    key = jax.random.PRNGKey(0)
    k1, k2, k3, k4, k5 = jax.random.split(key, 5)

    N, A, C = 2, 64, 4          # batch, anchors-per-image, classes (0 = background)
    loc_p = jax.random.normal(k1, (N, A, 4), jnp.float32)
    cls_p = jax.random.normal(k2, (N, A, C), jnp.float32)
    log_var_p = 0.1 * jax.random.normal(k3, (N, A, 4), jnp.float32)
    loc_t = jax.random.normal(k4, (N, A, 4), jnp.float32)
    cls_t = jax.random.randint(k5, (N, A), 0, C, jnp.int32)   # ~75% positives

    ref = _reference(loc_p, cls_p, log_var_p, loc_t, cls_t)

    # Default config (single tile covers the small test input).
    loss = kl_focal_loss(loc_p, cls_p, log_var_p, loc_t, cls_t)
    jax.block_until_ready(loss)
    # Tolerance accounts for the approx EUP reciprocal in the in-kernel sigmoid.
    np.testing.assert_allclose(np.asarray(loss), np.asarray(ref),
                               rtol=5e-3, atol=1e-3)

    # Multi-tile + 2-way parallel split + tail masking (128 rows, 48-row tiles).
    loss2 = kl_focal_loss(loc_p, cls_p, log_var_p, loc_t, cls_t,
                          tile=48, num_cores=2)
    jax.block_until_ready(loss2)
    np.testing.assert_allclose(np.asarray(loss2), np.asarray(ref),
                               rtol=5e-3, atol=1e-3)

    # num_pos == 0 -> loss is exactly 0 (matches the PyTorch early-return).
    loss0 = kl_focal_loss(loc_p, cls_p, log_var_p, loc_t, jnp.zeros_like(cls_t))
    jax.block_until_ready(loss0)
    assert float(loss0) == 0.0

    print("KERNEL_OK")
</pallas_src>

<mosaic_0001>
module attributes {stable_mosaic.version = 11 : i64} {
  func.func @_kl_focal_kernel(%arg0: i32, %arg1: i32, %arg2: memref<128x12xf32, #tpu.memory_space<vmem>>, %arg3: memref<128x4xf32, #tpu.memory_space<vmem>>, %arg4: memref<128x1xi32, #tpu.memory_space<vmem>>, %arg5: memref<1x8x128xf32, #tpu.memory_space<vmem>>, %arg6: memref<128x4xf32, #tpu.memory_space<vmem>>, %arg7: memref<128x4xf32, #tpu.memory_space<vmem>>, %arg8: memref<128x1xf32, #tpu.memory_space<vmem>>) attributes {dimension_semantics = [#tpu.dimension_semantics<parallel>, #tpu.dimension_semantics<arbitrary>], iteration_bounds = array<i64: 1, 1>, scalar_prefetch = 0 : i64, scratch_operands = 3 : i64, tpu.core_type = #tpu.core_type<tc>, window_params = [{transform_indices = @transform_0, window_bounds = array<i64: 128, 12>}, {transform_indices = @transform_1, window_bounds = array<i64: 128, 4>}, {transform_indices = @transform_2, window_bounds = array<i64: 128, 1>}, {transform_indices = @transform_3, window_bounds = array<i64: 1, 8, 128>}]} {
    %c0_i32 = arith.constant 0 : i32
    %0 = arith.cmpi eq, %arg1, %c0_i32 : i32
    %1 = arith.extui %0 : i1 to i32
    %c0_i32_0 = arith.constant 0 : i32
    %2 = arith.cmpi ne, %1, %c0_i32_0 : i32
    scf.if %2 {
      %cst_39 = arith.constant 0.000000e+00 : f32
      %95 = vector.broadcast %cst_39 : f32 to vector<128x4xf32>
      %c0_40 = arith.constant 0 : index
      %c0_41 = arith.constant 0 : index
      %96 = vector.load %arg6[%c0_40, %c0_41] : memref<128x4xf32, #tpu.memory_space<vmem>>, vector<128x4xf32>
      tpu.vector_store %arg6[%c0_40, %c0_41], %95 {strides = array<i32>} : memref<128x4xf32, #tpu.memory_space<vmem>>, vector<128x4xf32>,
      %cst_42 = arith.constant 0.000000e+00 : f32
      %97 = vector.broadcast %cst_42 : f32 to vector<128x4xf32>
      %c0_43 = arith.constant 0 : index
      %c0_44 = arith.constant 0 : index
      %98 = vector.load %arg7[%c0_43, %c0_44] : memref<128x4xf32, #tpu.memory_space<vmem>>, vector<128x4xf32>
      tpu.vector_store %arg7[%c0_43, %c0_44], %97 {strides = array<i32>} : memref<128x4xf32, #tpu.memory_space<vmem>>, vector<128x4xf32>,
      %cst_45 = arith.constant 0.000000e+00 : f32
      %99 = vector.broadcast %cst_45 : f32 to vector<128x1xf32>
      %c0_46 = arith.constant 0 : index
      %c0_47 = arith.constant 0 : index
      %100 = vector.load %arg8[%c0_46, %c0_47] : memref<128x1xf32, #tpu.memory_space<vmem>>, vector<128x1xf32>
      tpu.vector_store %arg8[%c0_46, %c0_47], %99 {strides = array<i32>} : memref<128x1xf32, #tpu.memory_space<vmem>>, vector<128x1xf32>,
    } else {
    }
    %c1_i32 = arith.constant 1 : i32
    %3 = arith.muli %arg0, %c1_i32 : i32
    %4 = arith.addi %3, %arg1 : i32
    %c128_i32 = arith.constant 128 : i32
    %5 = arith.muli %4, %c128_i32 : i32
    %6 = tpu.iota {dimensions = array<i32: 0>} : vector<128x1xi32>
    %7 = vector.broadcast %5 : i32 to vector<128x1xi32>
    %8 = arith.addi %6, %7 : vector<128x1xi32>
    %c128_i32_1 = arith.constant 128 : i32
    %9 = vector.broadcast %c128_i32_1 : i32 to vector<128x1xi32>
    %10 = arith.cmpi slt, %8, %9 : vector<128x1xi32>
    %c0 = arith.constant 0 : index
    %c0_2 = arith.constant 0 : index
    %11 = vector.load %arg4[%c0, %c0_2] : memref<128x1xi32, #tpu.memory_space<vmem>>, vector<128x1xi32>
    %c0_i32_3 = arith.constant 0 : i32
    %12 = vector.broadcast %c0_i32_3 : i32 to vector<128x1xi32>
    %13 = arith.cmpi ne, %11, %12 : vector<128x1xi32>
    %14 = arith.andi %13, %10 : vector<128x1xi1>
    %c0_4 = arith.constant 0 : index
    %c0_5 = arith.constant 0 : index
    %15 = vector.load %arg2[%c0_4, %c0_5] : memref<128x12xf32, #tpu.memory_space<vmem>>, vector<128x12xf32>
    %16 = vector.extract_strided_slice %15 {offsets = [0, 0], sizes = [128, 4], strides = [1, 1]} : vector<128x12xf32> to vector<128x4xf32>
    %17 = vector.extract_strided_slice %15 {offsets = [0, 4], sizes = [128, 4], strides = [1, 1]} : vector<128x12xf32> to vector<128x4xf32>
    %18 = vector.extract_strided_slice %15 {offsets = [0, 8], sizes = [128, 4], strides = [1, 1]} : vector<128x12xf32> to vector<128x4xf32>
    %19 = arith.subf %18, %16 : vector<128x4xf32>
    %20 = math.absf %19 : vector<128x4xf32>
    %cst = arith.constant 1.000000e+00 : f32
    %21 = vector.broadcast %cst : f32 to vector<128x4xf32>
    %22 = arith.cmpf olt, %20, %21 : vector<128x4xf32>
    %cst_6 = arith.constant 5.000000e-01 : f32
    %23 = vector.broadcast %cst_6 : f32 to vector<128x4xf32>
    %24 = arith.mulf %23, %20 : vector<128x4xf32>
    %25 = arith.mulf %24, %20 : vector<128x4xf32>
    %cst_7 = arith.constant 5.000000e-01 : f32
    %26 = vector.broadcast %cst_7 : f32 to vector<128x4xf32>
    %27 = arith.subf %20, %26 : vector<128x4xf32>
    %28 = arith.select %22, %25, %27 : vector<128x4xi1>, vector<128x4xf32>
    %cst_8 = arith.constant 0.000000e+00 : f32
    %29 = vector.broadcast %cst_8 : f32 to vector<128x4xf32>
    %30 = arith.subf %29, %17 : vector<128x4xf32>
    %31 = math.exp %30 : vector<128x4xf32>
    %32 = arith.mulf %31, %28 : vector<128x4xf32>
    %cst_9 = arith.constant 5.000000e-01 : f32
    %33 = vector.broadcast %cst_9 : f32 to vector<128x4xf32>
    %34 = arith.mulf %33, %17 : vector<128x4xf32>
    %35 = arith.addf %32, %34 : vector<128x4xf32>
    %c0_10 = arith.constant 0 : index
    %c0_11 = arith.constant 0 : index
    %36 = vector.load %arg6[%c0_10, %c0_11] : memref<128x4xf32, #tpu.memory_space<vmem>>, vector<128x4xf32>
    %cst_12 = arith.constant 0.000000e+00 : f32
    %37 = vector.shape_cast %14 : vector<128x1xi1> to vector<128x1xi1>
    %38 = vector.broadcast %37 : vector<128x1xi1> to vector<128x4xi1>
    %39 = vector.broadcast %cst_12 : f32 to vector<128x4xf32>
    %40 = arith.select %38, %35, %39 : vector<128x4xi1>, vector<128x4xf32>
    %41 = arith.addf %36, %40 : vector<128x4xf32>
    %c0_13 = arith.constant 0 : index
    %c0_14 = arith.constant 0 : index
    %42 = vector.load %arg6[%c0_13, %c0_14] : memref<128x4xf32, #tpu.memory_space<vmem>>, vector<128x4xf32>
    tpu.vector_store %arg6[%c0_13, %c0_14], %41 {strides = array<i32>} : memref<128x4xf32, #tpu.memory_space<vmem>>, vector<128x4xf32>,
    %c0_15 = arith.constant 0 : index
    %c0_16 = arith.constant 0 : index
    %43 = vector.load %arg3[%c0_15, %c0_16] : memref<128x4xf32, #tpu.memory_space<vmem>>, vector<128x4xf32>
    %44 = tpu.iota {dimensions = array<i32: 1>} : vector<128x4xi32>
    %45 = vector.broadcast %11 : vector<128x1xi32> to vector<128x4xi32>
    %46 = arith.cmpi eq, %44, %45 : vector<128x4xi32>
    %cst_17 = arith.constant 1.000000e+00 : f32
    %cst_18 = arith.constant 0.000000e+00 : f32
    %47 = vector.broadcast %cst_17 : f32 to vector<128x4xf32>
    %48 = vector.broadcast %cst_18 : f32 to vector<128x4xf32>
    %49 = arith.select %46, %47, %48 : vector<128x4xi1>, vector<128x4xf32>
    %50 = math.absf %43 : vector<128x4xf32>
    %cst_19 = arith.constant 0.000000e+00 : f32
    %51 = vector.broadcast %cst_19 : f32 to vector<128x4xf32>
    %52 = arith.subf %51, %50 : vector<128x4xf32>
    %53 = math.exp %52 : vector<128x4xf32>
    %cst_20 = arith.constant 1.000000e+00 : f32
    %54 = vector.broadcast %cst_20 : f32 to vector<128x4xf32>
    %55 = arith.addf %54, %53 : vector<128x4xf32>
    %56 = tpu.reciprocal %55 {approx = true} : vector<128x4xf32> -> vector<128x4xf32>
    %cst_21 = arith.constant 0.000000e+00 : f32
    %57 = vector.broadcast %cst_21 : f32 to vector<128x4xf32>
    %58 = arith.cmpf oge, %43, %57 : vector<128x4xf32>
    %59 = arith.mulf %53, %56 : vector<128x4xf32>
    %60 = arith.select %58, %56, %59 : vector<128x4xi1>, vector<128x4xf32>
    %cst_22 = arith.constant 0.000000e+00 : f32
    %61 = vector.broadcast %cst_22 : f32 to vector<128x4xf32>
    %62 = arith.maximumf %43, %61 : vector<128x4xf32>
    %63 = arith.mulf %43, %49 : vector<128x4xf32>
    %64 = arith.subf %62, %63 : vector<128x4xf32>
    %65 = math.log1p %53 : vector<128x4xf32>
    %66 = arith.addf %64, %65 : vector<128x4xf32>
    %67 = arith.subf %49, %60 : vector<128x4xf32>
    %68 = math.absf %67 : vector<128x4xf32>
    %cst_23 = arith.constant 2.500000e-01 : f32
    %69 = vector.broadcast %cst_23 : f32 to vector<128x4xf32>
    %70 = arith.mulf %69, %49 : vector<128x4xf32>
    %cst_24 = arith.constant 1.000000e+00 : f32
    %71 = vector.broadcast %cst_24 : f32 to vector<128x4xf32>
    %72 = arith.subf %71, %49 : vector<128x4xf32>
    %cst_25 = arith.constant 7.500000e-01 : f32
    %73 = vector.broadcast %cst_25 : f32 to vector<128x4xf32>
    %74 = arith.mulf %73, %72 : vector<128x4xf32>
    %75 = arith.addf %70, %74 : vector<128x4xf32>
    %76 = arith.mulf %75, %68 : vector<128x4xf32>
    %77 = arith.mulf %76, %68 : vector<128x4xf32>
    %78 = arith.mulf %77, %66 : vector<128x4xf32>
    %c0_26 = arith.constant 0 : index
    %c0_27 = arith.constant 0 : index
    %79 = vector.load %arg7[%c0_26, %c0_27] : memref<128x4xf32, #tpu.memory_space<vmem>>, vector<128x4xf32>
    %cst_28 = arith.constant 0.000000e+00 : f32
    %80 = vector.shape_cast %10 : vector<128x1xi1> to vector<128x1xi1>
    %81 = vector.broadcast %80 : vector<128x1xi1> to vector<128x4xi1>
    %82 = vector.broadcast %cst_28 : f32 to vector<128x4xf32>
    %83 = arith.select %81, %78, %82 : vector<128x4xi1>, vector<128x4xf32>
    %84 = arith.addf %79, %83 : vector<128x4xf32>
    %c0_29 = arith.constant 0 : index
    %c0_30 = arith.constant 0 : index
    %85 = vector.load %arg7[%c0_29, %c0_30] : memref<128x4xf32, #tpu.memory_space<vmem>>, vector<128x4xf32>
    tpu.vector_store %arg7[%c0_29, %c0_30], %84 {strides = array<i32>} : memref<128x4xf32, #tpu.memory_space<vmem>>, vector<128x4xf32>,
    %c0_31 = arith.constant 0 : index
    %c0_32 = arith.constant 0 : index
    %86 = vector.load %arg8[%c0_31, %c0_32] : memref<128x1xf32, #tpu.memory_space<vmem>>, vector<128x1xf32>
    %cst_33 = arith.constant 1.000000e+00 : f32
    %cst_34 = arith.constant 0.000000e+00 : f32
    %87 = vector.broadcast %cst_33 : f32 to vector<128x1xf32>
    %88 = vector.broadcast %cst_34 : f32 to vector<128x1xf32>
    %89 = arith.select %14, %87, %88 : vector<128x1xi1>, vector<128x1xf32>
    %90 = arith.addf %86, %89 : vector<128x1xf32>
    %c0_35 = arith.constant 0 : index
    %c0_36 = arith.constant 0 : index
    %91 = vector.load %arg8[%c0_35, %c0_36] : memref<128x1xf32, #tpu.memory_space<vmem>>, vector<128x1xf32>
    tpu.vector_store %arg8[%c0_35, %c0_36], %90 {strides = array<i32>} : memref<128x1xf32, #tpu.memory_space<vmem>>, vector<128x1xf32>,
    %c0_i32_37 = arith.constant 0 : i32
    %92 = arith.cmpi eq, %arg1, %c0_i32_37 : i32
    %93 = arith.extui %92 : i1 to i32
    %c0_i32_38 = arith.constant 0 : i32
    %94 = arith.cmpi ne, %93, %c0_i32_38 : i32
    scf.if %94 {
      %c0_39 = arith.constant 0 : index
      %c0_40 = arith.constant 0 : index
      %95 = vector.load %arg6[%c0_39, %c0_40] : memref<128x4xf32, #tpu.memory_space<vmem>>, vector<128x4xf32>
      %96 = vector.shape_cast %95 : vector<128x4xf32> to vector<1x128x4xf32>
      %cst_41 = arith.constant dense<0.000000e+00> : vector<1xf32>
      %97 = vector.multi_reduction <add>, %96, %cst_41 [1, 2] : vector<1x128x4xf32> to vector<1xf32>
      %98 = vector.shape_cast %97 : vector<1xf32> to vector<1x1x1xf32>
      %99 = vector.extract %98[0, 0, 0] : f32 from vector<1x1x1xf32>
      %c0_42 = arith.constant 0 : index
      %c0_43 = arith.constant 0 : index
      %100 = vector.load %arg7[%c0_42, %c0_43] : memref<128x4xf32, #tpu.memory_space<vmem>>, vector<128x4xf32>
      %101 = vector.shape_cast %100 : vector<128x4xf32> to vector<1x128x4xf32>
      %cst_44 = arith.constant dense<0.000000e+00> : vector<1xf32>
      %102 = vector.multi_reduction <add>, %101, %cst_44 [1, 2] : vector<1x128x4xf32> to vector<1xf32>
      %103 = vector.shape_cast %102 : vector<1xf32> to vector<1x1x1xf32>
      %104 = vector.extract %103[0, 0, 0] : f32 from vector<1x1x1xf32>
      %c0_45 = arith.constant 0 : index
      %c0_46 = arith.constant 0 : index
      %105 = vector.load %arg8[%c0_45, %c0_46] : memref<128x1xf32, #tpu.memory_space<vmem>>, vector<128x1xf32>
      %106 = vector.shape_cast %105 : vector<128x1xf32> to vector<1x128x1xf32>
      %cst_47 = arith.constant dense<0.000000e+00> : vector<1xf32>
      %107 = vector.multi_reduction <add>, %106, %cst_47 [1, 2] : vector<1x128x1xf32> to vector<1xf32>
      %108 = vector.shape_cast %107 : vector<1xf32> to vector<1x1x1xf32>
      %109 = vector.extract %108[0, 0, 0] : f32 from vector<1x1x1xf32>
      %110 = tpu.iota {dimensions = array<i32: 2>} : vector<1x8x128xi32>
      %c0_i32_48 = arith.constant 0 : i32
      %111 = vector.broadcast %c0_i32_48 : i32 to vector<1x8x128xi32>
      %112 = arith.cmpi eq, %110, %111 : vector<1x8x128xi32>
      %cst_49 = arith.constant 0.000000e+00 : f32
      %113 = vector.broadcast %99 : f32 to vector<1x8x128xf32>
      %114 = vector.broadcast %cst_49 : f32 to vector<1x8x128xf32>
      %115 = arith.select %112, %113, %114 : vector<1x8x128xi1>, vector<1x8x128xf32>
      %c1_i32_50 = arith.constant 1 : i32
      %116 = vector.broadcast %c1_i32_50 : i32 to vector<1x8x128xi32>
      %117 = arith.cmpi eq, %110, %116 : vector<1x8x128xi32>
      %cst_51 = arith.constant 0.000000e+00 : f32
      %118 = vector.broadcast %104 : f32 to vector<1x8x128xf32>
      %119 = vector.broadcast %cst_51 : f32 to vector<1x8x128xf32>
      %120 = arith.select %117, %118, %119 : vector<1x8x128xi1>, vector<1x8x128xf32>
      %121 = arith.addf %115, %120 : vector<1x8x128xf32>
      %c2_i32 = arith.constant 2 : i32
      %122 = vector.broadcast %c2_i32 : i32 to vector<1x8x128xi32>
      %123 = arith.cmpi eq, %110, %122 : vector<1x8x128xi32>
      %cst_52 = arith.constant 0.000000e+00 : f32
      %124 = vector.broadcast %109 : f32 to vector<1x8x128xf32>
      %125 = vector.broadcast %cst_52 : f32 to vector<1x8x128xf32>
      %126 = arith.select %123, %124, %125 : vector<1x8x128xi1>, vector<1x8x128xf32>
      %127 = arith.addf %121, %126 : vector<1x8x128xf32>
      %c0_53 = arith.constant 0 : index
      %c0_54 = arith.constant 0 : index
      %c0_55 = arith.constant 0 : index
      %128 = vector.load %arg5[%c0_53, %c0_54, %c0_55] : memref<1x8x128xf32, #tpu.memory_space<vmem>>, vector<1x8x128xf32>
      tpu.vector_store %arg5[%c0_53, %c0_54, %c0_55], %127 {strides = array<i32>} : memref<1x8x128xf32, #tpu.memory_space<vmem>>, vector<1x8x128xf32>,
    } else {
    }
    return
  }
  func.func @transform_0(%arg0: i32, %arg1: i32) -> (i32, i32) {
    %c1_i32 = arith.constant 1 : i32
    %0 = arith.muli %arg0, %c1_i32 : i32
    %1 = arith.addi %0, %arg1 : i32
    %c0_i32 = arith.constant 0 : i32
    %2 = arith.minsi %1, %c0_i32 : i32
    %c0_i32_0 = arith.constant 0 : i32
    %c0_i32_1 = arith.constant 0 : i32
    return %2, %c0_i32_0 : i32, i32
  }
  func.func @transform_1(%arg0: i32, %arg1: i32) -> (i32, i32) {
    %c1_i32 = arith.constant 1 : i32
    %0 = arith.muli %arg0, %c1_i32 : i32
    %1 = arith.addi %0, %arg1 : i32
    %c0_i32 = arith.constant 0 : i32
    %2 = arith.minsi %1, %c0_i32 : i32
    %c0_i32_0 = arith.constant 0 : i32
    %c0_i32_1 = arith.constant 0 : i32
    return %2, %c0_i32_0 : i32, i32
  }
  func.func @transform_2(%arg0: i32, %arg1: i32) -> (i32, i32) {
    %c1_i32 = arith.constant 1 : i32
    %0 = arith.muli %arg0, %c1_i32 : i32
    %1 = arith.addi %0, %arg1 : i32
    %c0_i32 = arith.constant 0 : i32
    %2 = arith.minsi %1, %c0_i32 : i32
    %c0_i32_0 = arith.constant 0 : i32
    %c0_i32_1 = arith.constant 0 : i32
    return %2, %c0_i32_0 : i32, i32
  }
  func.func @transform_3(%arg0: i32, %arg1: i32) -> (i32, i32, i32) {
    %c0_i32 = arith.constant 0 : i32
    %c0_i32_0 = arith.constant 0 : i32
    %c0_i32_1 = arith.constant 0 : i32
    return %arg0, %c0_i32, %c0_i32_0 : i32, i32, i32
  }
}

</mosaic_0001>

<bundles_post_ra>
// kernel: tpu_custom_call.1
= control target key start
LH: loop header
LB: loop body
LE: loop exit
PB: predicated region body
PF: predicated region fallthrough
CT: control target
= control target key end

     0   :  { %s1989_s16 = smov 8   ;;  %vm148_vm0 = vcmask 7168   ;;  %v1990_v4 = vmov 0   ;;  %v3489_v5 = vmov 0.0   ;;  %s3485_s0 = inlined_call_operand.vmem [shape: f32[128,12], index: 0, kind: input, shape index: {}]   ;;  %s3486_s1 = inlined_call_operand.vmem [shape: f32[128,4], index: 1, kind: input, shape index: {}]   ;;  %s3487_s2 = inlined_call_operand.vmem [shape: s32[128,1], index: 2, kind: input, shape index: {}]   ;;  %s3488_s3 = inlined_call_operand.hbm [shape: f32[1,8,128], index: 3, kind: output, shape index: {}]  }
   0x1   :  { %v2017_v0 = vld [vmem:[%s3485_s0] sm:$0xff]  ;;  %v2022_v1 = vld [vmem:[%s3485_s0 + $0x10] sm:$0xff]  ;;  %v2031_v2 = vld [vmem:[%s3485_s0 + $0x8] sm:$0xff]  ;;  %1824 = vset.pattern.permute.xlu1 %v1990_v4  ;;  %150 = vst.msk [vmem:[#allocation4 + $0x8] sm:$0xff] %vm148_vm0, %v3489_v5  ;;  %1823 = vset.pattern.permute.xlu0 %v1990_v4 }
   0x2   :  { %297 = vrot.lane.b32.xlu0 %v2017_v0, %s1989_s16  ;;  %301 = vrot.lane.b32.xlu1 %v2022_v1, %s1989_s16  ;;  %v2036_v3 = vld [vmem:[%s3485_s0 + $0x18] sm:$0xff]  ;;  %149 = vst.msk [vmem:[#allocation4] sm:$0xff] %vm148_vm0, %v3489_v5  ;;  %151 = vst.msk [vmem:[#allocation4 + $0x10] sm:$0xff] %vm148_vm0, %v3489_v5  ;;  %v2079_v6 = vld [vmem:[%s3485_s0 + $0x20] sm:$0xff] }
   0x3   :  { %152 = vst.msk [vmem:[#allocation4 + $0x18] sm:$0xff] %vm148_vm0, %v3489_v5  ;;  %153 = vst.msk [vmem:[#allocation4 + $0x20] sm:$0xff] %vm148_vm0, %v3489_v5  ;;  %v2084_v7 = vld [vmem:[%s3485_s0 + $0x28] sm:$0xff]  ;;  %v2093_v8 = vld [vmem:[%s3485_s0 + $0x30] sm:$0xff] }
   0x4   :  { %154 = vst.msk [vmem:[#allocation4 + $0x28] sm:$0xff] %vm148_vm0, %v3489_v5  ;;  %155 = vst.msk [vmem:[#allocation4 + $0x30] sm:$0xff] %vm148_vm0, %v3489_v5  ;;  %v2098_v9 = vld [vmem:[%s3485_s0 + $0x38] sm:$0xff]  ;;  %v2103_v10 = vld [vmem:[%s3487_s2 + $0x8] sm:$0xff] }
   0x5   :  { %156 = vst.msk [vmem:[#allocation4 + $0x38] sm:$0xff] %vm148_vm0, %v3489_v5  ;;  %157 = vst.msk [vmem:[#allocation4 + $0x40] sm:$0xff] %vm148_vm0, %v3489_v5  ;;  %vm234_vm1 = vcmp.ne.s32.totalorder %v2103_v10, 0  ;;  %v2109_v12 = vld [vmem:[%s3487_s2 + $0x10] sm:$0xff]  ;;  %v2117_v15 = vld [vmem:[%s3487_s2 + $0x18] sm:$0xff] }
   0x6   :  { %158 = vst.msk [vmem:[#allocation4 + $0x48] sm:$0xff] %vm148_vm0, %v3489_v5  ;;  %159 = vst.msk [vmem:[#allocation4 + $0x50] sm:$0xff] %vm148_vm0, %v3489_v5  ;;  %299 = vrot.lane.b32.xlu0 %v2031_v2, %s1989_s16  ;;  %303 = vrot.lane.b32.xlu1 %v2036_v3, %s1989_s16  ;;  %v1533_v13 = vsel %vm234_vm1, 1.0, %v3489_v5  ;;  %vm235_vm2 = vcmp.ne.s32.totalorder %v2109_v12, 0  ;;  %v2127_v18 = vld [vmem:[%s3487_s2 + $0x20] sm:$0xff]  ;;  %v2137_v20 = vld [vmem:[%s3485_s0 + $0x48] sm:$0xff] }
   0x7   :  { %160 = vst.msk [vmem:[#allocation4 + $0x58] sm:$0xff] %vm148_vm0, %v3489_v5  ;;  %161 = vst.msk [vmem:[#allocation4 + $0x60] sm:$0xff] %vm148_vm0, %v3489_v5  ;;  %v2132_v19 = vld [vmem:[%s3485_s0 + $0x40] sm:$0xff]  ;;  %v1534_v21 = vsel %vm235_vm2, 1.0, %v3489_v5  ;;  %vm236_vm3 = vcmp.ne.s32.totalorder %v2117_v15, 0  ;;  %v2146_v22 = vld [vmem:[%s3487_s2 + $0x28] sm:$0xff] }
   0x8   :  { %162 = vst.msk [vmem:[#allocation4 + $0x68] sm:$0xff] %vm148_vm0, %v3489_v5  ;;  %163 = vst.msk [vmem:[#allocation4 + $0x70] sm:$0xff] %vm148_vm0, %v3489_v5  ;;  %v1517_v11 = vld [vmem:[#allocation4 + $0x8] sm:$0xff]  ;;  %v1535_v24 = vsel %vm236_vm3, 1.0, %v3489_v5  ;;  %v2155_v26 = vld [vmem:[%s3487_s2 + $0x30] sm:$0xff]  ;;  %vm237_vm4 = vcmp.ne.s32.totalorder %v2127_v18, 0 }
   0x9   :  { %164 = vst.msk [vmem:[#allocation4 + $0x78] sm:$0xff] %vm148_vm0, %v3489_v5  ;;  %v1518_v14 = vld [vmem:[#allocation4 + $0x10] sm:$0xff]  ;;  %v1549_v16 = vadd.f32 %v1533_v13, %v1517_v11  ;;  %v1536_v29 = vsel %vm237_vm4, 1.0, %v3489_v5  ;;  %vm238_vm5 = vcmp.ne.s32.totalorder %v2146_v22, 0  ;;  %v2170_v31 = vld [vmem:[%s3487_s2] sm:$0xff]  ;;  %v2175_v32 = vld [vmem:[%s3487_s2 + $0x38] sm:$0xff] }
   0xa   :  { %305 = vrot.lane.b32.xlu0 %v2079_v6, %s1989_s16  ;;  %307 = vrot.lane.b32.xlu1 %v2084_v7, %s1989_s16  ;;  %v1519_v17 = vld [vmem:[#allocation4 + $0x18] sm:$0xff]  ;;  %v1550_v23 = vadd.f32 %v1534_v21, %v1518_v14  ;;  %v1520_v25 = vld [vmem:[#allocation4 + $0x20] sm:$0xff]  ;;  %v2180_v33 = vld [vmem:[%s3485_s0 + $0x50] sm:$0xff]  ;;  %v1537_v36 = vsel %vm238_vm5, 1.0, %v3489_v5  ;;  %vm239_vm6 = vcmp.ne.s32.totalorder %v2155_v26, 0  ;;  %vm233_vm7 = vcmp.ne.s32.totalorder %v2170_v31, 0 }
   0xb   :  { %1566 = vst.msk [vmem:[#allocation4 + $0x8] sm:$0xff] %vm148_vm0, %v1549_v16  ;;  %v1551_v27 = vadd.f32 %v1535_v24, %v1519_v17  ;;  %v1521_v28 = vld [vmem:[#allocation4 + $0x28] sm:$0xff]  ;;  %v1522_v30 = vld [vmem:[#allocation4 + $0x30] sm:$0xff]  ;;  %v2185_v34 = vld [vmem:[%s3485_s0 + $0x58] sm:$0xff]  ;;  %v1552_v35 = vadd.f32 %v1536_v29, %v1520_v25  ;;  %v1538_v39 = vsel %vm239_vm6, 1.0, %v3489_v5  ;;  %vm240_vm8 = vcmp.ne.s32.totalorder %v2175_v32, 0 }
   0xc   :  { %1567 = vst.msk [vmem:[#allocation4 + $0x10] sm:$0xff] %vm148_vm0, %v1550_v23  ;;  %v1516_v37 = vld [vmem:[#allocation4] sm:$0xff]  ;;  %v1553_v38 = vadd.f32 %v1537_v36, %v1521_v28  ;;  %v1523_v40 = vld [vmem:[#allocation4 + $0x38] sm:$0xff]  ;;  %v2203_v42 = vld [vmem:[%s3487_s2 + $0x48] sm:$0xff]  ;;  %v1554_v44 = vadd.f32 %v1538_v39, %v1522_v30  ;;  %v1532_v46 = vsel %vm233_vm7, 1.0, %v3489_v5  ;;  %v1539_v47 = vsel %vm240_vm8, 1.0, %v3489_v5 }
   0xd   :  { %1568 = vst.msk [vmem:[#allocation4 + $0x18] sm:$0xff] %vm148_vm0, %v1551_v27  ;;  %v2198_v41 = vld [vmem:[%s3487_s2 + $0x40] sm:$0xff]  ;;  %1569 = vst.msk [vmem:[#allocation4 + $0x20] sm:$0xff] %vm148_vm0, %v1552_v35  ;;  %v1525_v48 = vld [vmem:[#allocation4 + $0x48] sm:$0xff]  ;;  %v1548_v52 = vadd.f32 %v1532_v46, %v1516_v37  ;;  %v1555_v53 = vadd.f32 %v1539_v47, %v1523_v40  ;;  %vm242_vm10 = vcmp.ne.s32.totalorder %v2203_v42, 0 }
   0xe   :  { %309 = vrot.lane.b32.xlu0 %v2093_v8, %s1989_s16  ;;  %311 = vrot.lane.b32.xlu1 %v2098_v9, %s1989_s16  ;;  %v2208_v43 = vld [vmem:[%s3485_s0 + $0x60] sm:$0xff]  ;;  %1570 = vst.msk [vmem:[#allocation4 + $0x28] sm:$0xff] %vm148_vm0, %v1553_v38  ;;  %v2227_v49 = vld [vmem:[%s3487_s2 + $0x50] sm:$0xff]  ;;  %1571 = vst.msk [vmem:[#allocation4 + $0x30] sm:$0xff] %vm148_vm0, %v1554_v44  ;;  %vm241_vm9 = vcmp.ne.s32.totalorder %v2198_v41, 0 }
   0xf   :  { %v1524_v45 = vld [vmem:[#allocation4 + $0x40] sm:$0xff]  ;;  %v2232_v50 = vld [vmem:[%s3487_s2 + $0x58] sm:$0xff]  ;;  %v2237_v51 = vld [vmem:[%s3485_s0 + $0x68] sm:$0xff] }
  0x10   :  { %v1526_v54 = vld [vmem:[#allocation4 + $0x50] sm:$0xff] }
  0x12   :  { %313 = vrot.lane.b32.xlu0 %v2132_v19, %s1989_s16  ;;  %315 = vrot.lane.b32.xlu1 %v2137_v20, %s1989_s16 }
  0x16   :  { %317 = vrot.lane.b32.xlu0 %v2180_v33, %s1989_s16  ;;  %319 = vrot.lane.b32.xlu1 %v2185_v34, %s1989_s16 }
  0x17   :  { %8 = vsyncpa [#allocation6], 0  ;;  %v1540_v55 = vsel %vm241_vm9, 1.0, %v3489_v5  ;;  %v2246_v56 = vsel %vm242_vm10, 1, %v1990_v4  ;;  %v1541_v57 = vsel %vm242_vm10, 1.0, %v3489_v5  ;;  %v1527_v58 = vld [vmem:[#allocation4 + $0x58] sm:$0xff] }
  0x18   :  { %v2252_v59 = vld [vmem:[%s3487_s2 + $0x60] sm:$0xff]  ;;  %v2257_v60 = vld [vmem:[%s3487_s2 + $0x68] sm:$0xff]  ;;  %1565 = vst.msk [vmem:[#allocation4] sm:$0xff] %vm148_vm0, %v1548_v52  ;;  %1572 = vst.msk [vmem:[#allocation4 + $0x38] sm:$0xff] %vm148_vm0, %v1555_v53  ;;  %v1556_v61 = vadd.f32 %v1540_v55, %v1524_v45  ;;  %v1557_v62 = vadd.f32 %v1541_v57, %v1525_v48  ;;  %vm243_vm11 = vcmp.ne.s32.totalorder %v2227_v49, 0  ;;  %vm244_vm12 = vcmp.ne.s32.totalorder %v2232_v50, 0 }
  0x19   :  { %v1528_v63 = vld [vmem:[#allocation4 + $0x60] sm:$0xff]  ;;  %v1529_v11 = vld [vmem:[#allocation4 + $0x68] sm:$0xff]  ;;  %v2268_v13 = vsel %vm243_vm11, 1, %v1990_v4  ;;  %v1542_v14 = vsel %vm243_vm11, 1.0, %v3489_v5  ;;  %v2272_v16 = vsel %vm244_vm12, 1, %v1990_v4  ;;  %v1543_v17 = vsel %vm244_vm12, 1.0, %v3489_v5 }
  0x1a   :  { %321 = vrot.lane.b32.xlu0 %v2208_v43, %s1989_s16  ;;  %323 = vrot.lane.b32.xlu1 %v2237_v51, %s1989_s16  ;;  %v2278_v21 = vld [vmem:[%s3487_s2 + $0x70] sm:$0xff]  ;;  %v232_v23 = vld [vmem:[%s3487_s2 + $0x78] sm:$0xff]  ;;  %1573 = vst.msk [vmem:[#allocation4 + $0x40] sm:$0xff] %vm148_vm0, %v1556_v61  ;;  %1574 = vst.msk [vmem:[#allocation4 + $0x48] sm:$0xff] %vm148_vm0, %v1557_v62  ;;  %v1558_v27 = vadd.f32 %v1542_v14, %v1526_v54  ;;  %v1559_v28 = vadd.f32 %v1543_v17, %v1527_v58  ;;  %vm245_vm13 = vcmp.ne.s32.totalorder %v2252_v59, 0  ;;  %s1992_s26 = smov 124  }
  0x1b   :  { %v2286_v24 = vld [vmem:[%s3485_s0 + $0x70] sm:$0xff]  ;;  %v2291_v25 = vld [vmem:[%s3485_s0 + $0x78] sm:$0xff]  ;;  %vm246_vm14 = vcmp.ne.s32.totalorder %v2257_v60, 0  ;;  %v2298_v29 = vsel %vm245_vm13, 1, %v1990_v4  ;;  %v1544_v30 = vsel %vm245_vm13, 1.0, %v3489_v5  ;;  %vm247_vm15 = vcmp.ne.s32.totalorder %v2278_v21, 0 }
  0x1c   :  { %v2302_v35 = vsel %vm246_vm14, 1, %v1990_v4  ;;  %v1545_v36 = vsel %vm246_vm14, 1.0, %v3489_v5  ;;  %v1530_v37 = vld [vmem:[#allocation4 + $0x70] sm:$0xff]  ;;  %v1531_v38 = vld [vmem:[#allocation4 + $0x78] sm:$0xff]  ;;  %1575 = vst.msk [vmem:[#allocation4 + $0x50] sm:$0xff] %vm148_vm0, %v1558_v27  ;;  %1576 = vst.msk [vmem:[#allocation4 + $0x58] sm:$0xff] %vm148_vm0, %v1559_v28  ;;  %v1560_v39 = vadd.f32 %v1544_v30, %v1528_v63 }
  0x1d   :  { %v1561_v40 = vadd.f32 %v1545_v36, %v1529_v11  ;;  %vm248_vm10 = vcmp.ne.s32.totalorder %v232_v23, 0  ;;  %v2313_v44 = vsel %vm247_vm15, 1, %v1990_v4  ;;  %v1546_v45 = vsel %vm247_vm15, 1.0, %v3489_v5  ;;  %s1993_s5 = smov [#allocation5]  }
  0x1e   :  { %325 = vrot.lane.b32.xlu0 %v2286_v24, %s1989_s16  ;;  %327 = vrot.lane.b32.xlu1 %v2291_v25, %s1989_s16  ;;  %v2317_v46 = vsel %vm248_vm10, 1, %v1990_v4  ;;  %v1547_v47 = vsel %vm248_vm10, 1.0, %v3489_v5  ;;  %v634_v48 = vsel %vm234_vm1, 1, %v1990_v4  ;;  %v633_v52 = vsel %vm233_vm7, 1, %v1990_v4  ;;  %1577 = vst.msk [vmem:[#allocation4 + $0x60] sm:$0xff] %vm148_vm0, %v1560_v39  ;;  %s1770_s6 = sshll.u32 %s1993_s5, 4  ;;  %s1771_s6 = int_to_ptr.vmem [resolvable:$true] %s1770_s6 }
  0x1f   :  { %1578 = vst.msk [vmem:[#allocation4 + $0x68] sm:$0xff] %vm148_vm0, %v1561_v40  ;;  %v1562_v53 = vadd.f32 %v1546_v45, %v1530_v37  ;;  %v1563_v54 = vadd.f32 %v1547_v47, %v1531_v38  ;;  %v635_v55 = vsel %vm235_vm2, 1, %v1990_v4  ;;  %v636_v57 = vsel %vm236_vm3, 1, %v1990_v4  ;;  %s1967_s7 = scalar_lea.vmem %s1771_s6, 128  ;;  %p1972_p1 = scmp.lt.s32.totalorder %s1771_s6, %s1771_s6 }
  0x20   :  { %v637_v58 = vsel %vm237_vm4, 1, %v1990_v4  ;;  %v638_v61 = vsel %vm238_vm5, 1, %v1990_v4  ;;  %v639_v62 = vsel %vm239_vm6, 1, %v1990_v4  ;;  %v641_v63 = vsel %vm241_vm9, 1, %v1990_v4  ;;  %p1968_p0 = scmp.ne.s32.totalorder %s1771_s6, %s1967_s7  ;;  %p1973_p2 = scmp.lt.s32.totalorder %s1967_s7, %s1967_s7 }
  0x21   :  { %1579 = vst.msk [vmem:[#allocation4 + $0x70] sm:$0xff] %vm148_vm0, %v1562_v53  ;;  %1580 = vst.msk [vmem:[#allocation4 + $0x78] sm:$0xff] %vm148_vm0, %v1563_v54  ;;  %vm115_vm1 = vcmask 31744  }
  0x22   :  { %653 = vperm.xlu1 %1824, %v634_v48   ;;  %650 = vperm.xlu0 %1823, %v633_v52   ;;  %133 = vst.msk [vmem:[#allocation3 + $0x8] sm:$0xff] %vm115_vm1, %v3489_v5  ;;  %116 = vst.msk [vmem:[#allocation2] sm:$0xff] %vm115_vm1, %v3489_v5  ;;  %p1974_p3 = por %p1973_p2, %p1972_p1 }
  0x23   :  { %117 = vst.msk [vmem:[#allocation2 + $0x8] sm:$0xff] %vm115_vm1, %v3489_v5  ;;  %118 = vst.msk [vmem:[#allocation2 + $0x10] sm:$0xff] %vm115_vm1, %v3489_v5 }
  0x24   :  { %119 = vst.msk [vmem:[#allocation2 + $0x18] sm:$0xff] %vm115_vm1, %v3489_v5  ;;  %120 = vst.msk [vmem:[#allocation2 + $0x20] sm:$0xff] %vm115_vm1, %v3489_v5  ;;  %p1975_p4 = pnand %p1974_p3, %p1968_p0 }
  0x25   :  { %121 = vst.msk [vmem:[#allocation2 + $0x28] sm:$0xff] %vm115_vm1, %v3489_v5  ;;  %122 = vst.msk [vmem:[#allocation2 + $0x30] sm:$0xff] %vm115_vm1, %v3489_v5 }
  0x26   :  { %656 = vperm.xlu1 %1824, %v635_v55   ;;  %848 = vperm.xlu0 %1823, %v2103_v10   ;;  %v640_v10 = vsel %vm240_vm8, 1, %v1990_v4  ;;  %123 = vst.msk [vmem:[#allocation2 + $0x38] sm:$0xff] %vm115_vm1, %v3489_v5  ;;  %124 = vst.msk [vmem:[#allocation2 + $0x40] sm:$0xff] %vm115_vm1, %v3489_v5  ;;  %v2419_v4 = vld [vmem:[%s3486_s1 + $0x8] sm:$0xff] }
  0x27   :  { %125 = vst.msk [vmem:[#allocation2 + $0x48] sm:$0xff] %vm115_vm1, %v3489_v5  ;;  %126 = vst.msk [vmem:[#allocation2 + $0x50] sm:$0xff] %vm115_vm1, %v3489_v5  ;;  %v925_v11 = vand.u32 2147483647, %v2419_v4  ;;  %vm1021_vm12 = vcmp.ge.f32.partialorder %v2419_v4, 0.0 }
  0x28   :  { %127 = vst.msk [vmem:[#allocation2 + $0x58] sm:$0xff] %vm115_vm1, %v3489_v5  ;;  %128 = vst.msk [vmem:[#allocation2 + $0x60] sm:$0xff] %vm115_vm1, %v3489_v5 }
  0x29   :  { %129 = vst.msk [vmem:[#allocation2 + $0x68] sm:$0xff] %vm115_vm1, %v3489_v5  ;;  %130 = vst.msk [vmem:[#allocation2 + $0x70] sm:$0xff] %vm115_vm1, %v3489_v5  ;;  %v941_v14 = vsub.f32 0.0, %v925_v11 }
  0x2a   :  { %659 = vperm.xlu1 %1824, %v636_v57   ;;  %131 = vst.msk [vmem:[#allocation2 + $0x78] sm:$0xff] %vm115_vm1, %v3489_v5  ;;  %132 = vst.msk [vmem:[#allocation3] sm:$0xff] %vm115_vm1, %v3489_v5 }
  0x2b   :  { %134 = vst.msk [vmem:[#allocation3 + $0x10] sm:$0xff] %vm115_vm1, %v3489_v5  ;;  %135 = vst.msk [vmem:[#allocation3 + $0x18] sm:$0xff] %vm115_vm1, %v3489_v5  ;;  %v958_v27 = vmul.f32 1.442695, %v941_v14 }
  0x2c   :  { %136 = vst.msk [vmem:[#allocation3 + $0x20] sm:$0xff] %vm115_vm1, %v3489_v5  ;;  %137 = vst.msk [vmem:[#allocation3 + $0x28] sm:$0xff] %vm115_vm1, %v3489_v5 }
  0x2d   :  { %138 = vst.msk [vmem:[#allocation3 + $0x30] sm:$0xff] %vm115_vm1, %v3489_v5  ;;  %139 = vst.msk [vmem:[#allocation3 + $0x38] sm:$0xff] %vm115_vm1, %v3489_v5  ;;  %1825 = vpow2.f32 %v958_v27 }
  0x2e   :  { %662 = vperm.xlu1 %1824, %v637_v58   ;;  %140 = vst.msk [vmem:[#allocation3 + $0x40] sm:$0xff] %vm115_vm1, %v3489_v5  ;;  %141 = vst.msk [vmem:[#allocation3 + $0x48] sm:$0xff] %vm115_vm1, %v3489_v5 }
  0x2f   :  { %142 = vst.msk [vmem:[#allocation3 + $0x50] sm:$0xff] %vm115_vm1, %v3489_v5  ;;  %143 = vst.msk [vmem:[#allocation3 + $0x58] sm:$0xff] %vm115_vm1, %v3489_v5 }
  0x30   :  { %144 = vst.msk [vmem:[#allocation3 + $0x60] sm:$0xff] %vm115_vm1, %v3489_v5  ;;  %145 = vst.msk [vmem:[#allocation3 + $0x68] sm:$0xff] %vm115_vm1, %v3489_v5 }
  0x31   :  { %146 = vst.msk [vmem:[#allocation3 + $0x70] sm:$0xff] %vm115_vm1, %v3489_v5  ;;  %147 = vst.msk [vmem:[#allocation3 + $0x78] sm:$0xff] %vm115_vm1, %v3489_v5 }
  0x32   :  { %665 = vperm.xlu1 %1824, %v638_v61  }
  0x36   :  { %668 = vperm.xlu1 %1824, %v639_v62  }
  0x3a   :  { %671 = vperm.xlu1 %1824, %v640_v10  }
  0x3e   :  { %674 = vperm.xlu1 %1824, %v641_v63  }
  0x74   :  { %v298_v17 = vpop.permute.xlu0 %297  ;;  %v302_v23 = vpop.permute.xlu1 %301 }
  0x75   :  { %v345_v28 = vsub.f32 %v2017_v0, %v298_v17  ;;  %v347_v30 = vsub.f32 %v2022_v1, %v302_v23 }
  0x77   :  { %v361_v36 = vand.u32 2147483647, %v345_v28  ;;  %v363_v38 = vand.u32 2147483647, %v347_v30 }
  0x78   :  { %v300_v37 = vpop.permute.xlu0 %299  ;;  %v304_v39 = vpop.permute.xlu1 %303 }
  0x79   :  { %v346_v40 = vsub.f32 %v2031_v2, %v300_v37  ;;  %v348_v45 = vsub.f32 %v2036_v3, %v304_v39  ;;  %v393_v47 = vmul.f32 0.5, %v361_v36  ;;  %v1796_v53 = vadd.f32 -0.5, %v361_v36 }
  0x7a   :  { %vm377_vm2 = vcmp.lt.f32.partialorder %v361_v36, 1.0  ;;  %v395_v55 = vmul.f32 0.5, %v363_v38  ;;  %vm379_vm4 = vcmp.lt.f32.partialorder %v363_v38, 1.0  ;;  %v1798_v17 = vadd.f32 -0.5, %v363_v38 }
  0x7b   :  { %v362_v48 = vand.u32 2147483647, %v346_v40  ;;  %v409_v52 = vmul.f32 %v393_v47, %v361_v36  ;;  %v364_v57 = vand.u32 2147483647, %v348_v45  ;;  %v2431_v40 = vpop.eup %1825 }
  0x7c   :  { %v306_v54 = vpop.permute.xlu0 %305  ;;  %v308_v10 = vpop.permute.xlu1 %307  ;;  %v411_v14 = vmul.f32 %v395_v55, %v363_v38 }
  0x7d   :  { %v441_v58 = vsel %vm377_vm2, %v409_v52, %v1796_v53  ;;  %v349_v61 = vsub.f32 %v2079_v6, %v306_v54  ;;  %v394_v62 = vmul.f32 0.5, %v362_v48  ;;  %v1797_v11 = vadd.f32 -0.5, %v362_v48 }
  0x7e   :  { %521 = vrot.lane.b32.xlu1 %v441_v58, %s1992_s26  ;;  %vm378_vm3 = vcmp.lt.f32.partialorder %v362_v48, 1.0  ;;  %v350_v28 = vsub.f32 %v2084_v7, %v308_v10  ;;  %v396_v30 = vmul.f32 0.5, %v364_v57  ;;  %v443_v37 = vsel %vm379_vm4, %v411_v14, %v1798_v17 }
  0x7f   :  { %v410_v63 = vmul.f32 %v394_v62, %v362_v48  ;;  %v365_v23 = vand.u32 2147483647, %v349_v61  ;;  %v1799_v39 = vadd.f32 -0.5, %v364_v57  ;;  %vm380_vm5 = vcmp.lt.f32.partialorder %v364_v57, 1.0 }
  0x80   :  { %v310_v36 = vpop.permute.xlu0 %309  ;;  %v366_v45 = vand.u32 2147483647, %v350_v28  ;;  %v412_v48 = vmul.f32 %v396_v30, %v364_v57  ;;  %v312_v52 = vpop.permute.xlu1 %311  ;;  %v989_v54 = vadd.f32 1.0, %v2431_v40 }
  0x81   :  { %v442_v27 = vsel %vm378_vm3, %v410_v63, %v1797_v11  ;;  %v351_v47 = vsub.f32 %v2093_v8, %v310_v36  ;;  %v397_v38 = vmul.f32 0.5, %v365_v23  ;;  %v1800_v53 = vadd.f32 -0.5, %v365_v23 }
  0x82   :  { %677 = vperm.xlu1 %1824, %v2246_v56   ;;  %523 = vrot.lane.b32.xlu0 %v442_v27, %s1992_s26  ;;  %v352_v56 = vsub.f32 %v2098_v9, %v312_v52  ;;  %v444_v58 = vsel %vm380_vm5, %v412_v48, %v1799_v39  ;;  %v398_v62 = vmul.f32 0.5, %v366_v45  ;;  %vm381_vm6 = vcmp.lt.f32.partialorder %v365_v23, 1.0 }
  0x83   :  { %v367_v55 = vand.u32 2147483647, %v351_v47  ;;  %v413_v61 = vmul.f32 %v397_v38, %v365_v23  ;;  %1827 = vrcp.f32 %v989_v54  ;;  %vm382_vm7 = vcmp.lt.f32.partialorder %v366_v45, 1.0 }
  0x84   :  { %v314_v10 = vpop.permute.xlu0 %313  ;;  %v368_v63 = vand.u32 2147483647, %v352_v56  ;;  %v414_v14 = vmul.f32 %v398_v62, %v366_v45  ;;  %v316_v17 = vpop.permute.xlu1 %315  ;;  %1829 = vlog2.f32 %v989_v54 }
  0x85   :  { %v445_v11 = vsel %vm381_vm6, %v413_v61, %v1800_v53  ;;  %v353_v57 = vsub.f32 %v2132_v19, %v314_v10  ;;  %v399_v27 = vmul.f32 0.5, %v367_v55  ;;  %v1802_v28 = vadd.f32 -0.5, %v367_v55 }
  0x86   :  { %680 = vperm.xlu1 %1824, %v2268_v13   ;;  %525 = vrot.lane.b32.xlu0 %v443_v37, %s1992_s26  ;;  %v1801_v13 = vadd.f32 -0.5, %v366_v45  ;;  %v400_v39 = vmul.f32 0.5, %v368_v63  ;;  %vm383_vm8 = vcmp.lt.f32.partialorder %v367_v55, 1.0  ;;  %v1803_v48 = vadd.f32 -0.5, %v368_v63 }
  0x87   :  { %v369_v30 = vand.u32 2147483647, %v353_v57  ;;  %v415_v36 = vmul.f32 %v399_v27, %v367_v55  ;;  %vm384_vm9 = vcmp.lt.f32.partialorder %v368_v63, 1.0 }
  0x88   :  { %v446_v23 = vsel %vm382_vm7, %v414_v14, %v1801_v13  ;;  %v318_v37 = vpop.permute.xlu0 %317  ;;  %v416_v45 = vmul.f32 %v400_v39, %v368_v63  ;;  %v320_v38 = vpop.permute.xlu1 %319 }
  0x89   :  { %v355_v52 = vsub.f32 %v2180_v33, %v318_v37  ;;  %v401_v56 = vmul.f32 0.5, %v369_v30  ;;  %vm385_vm11 = vcmp.lt.f32.partialorder %v369_v30, 1.0  ;;  %v1131_v37 = vand.u32 2147483647, %v2431_v40 }
  0x8a   :  { %683 = vperm.xlu1 %1824, %v2272_v16   ;;  %527 = vrot.lane.b32.xlu0 %v444_v58, %s1992_s26  ;;  %v354_v16 = vsub.f32 %v2137_v20, %v316_v17  ;;  %v1804_v58 = vadd.f32 -0.5, %v369_v30  ;;  %v448_v54 = vsel %vm384_vm9, %v416_v45, %v1803_v48  ;;  %v1069_v45 = vmax.f32 %v2419_v4, 0.0 }
  0x8b   :  { %v371_v55 = vand.u32 2147483647, %v355_v52  ;;  %v417_v62 = vmul.f32 %v401_v56, %v369_v30  ;;  %vm2470_vm15 = vcmp.lt.f32.partialorder %v1131_v37, 0.0004427343 }
  0x8c   :  { %v370_v47 = vand.u32 2147483647, %v354_v16  ;;  %v322_v53 = vpop.permute.xlu0 %321  ;;  %v324_v63 = vpop.permute.xlu1 %323 }
  0x8d   :  { %v449_v27 = vsel %vm385_vm11, %v417_v62, %v1804_v58  ;;  %v357_v16 = vsub.f32 %v2208_v43, %v322_v53  ;;  %v358_v39 = vsub.f32 %v2237_v51, %v324_v63  ;;  %vm387_vm14 = vcmp.lt.f32.partialorder %v371_v55, 1.0  ;;  %v1421_v58 = vld [vmem:[#allocation3 + $0x8] sm:$0xff] }
  0x8e   :  { %686 = vperm.xlu1 %1824, %v2298_v29   ;;  %529 = vrot.lane.b32.xlu0 %v445_v11, %s1992_s26  ;;  %v447_v29 = vsel %vm383_vm8, %v415_v36, %v1802_v28  ;;  %v402_v10 = vmul.f32 0.5, %v370_v47  ;;  %v842_v11 = vlaneseq  ;;  %v1805_v14 = vadd.f32 -0.5, %v370_v47 }
  0x8f   :  { %vm386_vm13 = vcmp.lt.f32.partialorder %v370_v47, 1.0 }
  0x90   :  { %v1828_v61 = vpop.eup %1827  ;;  %v326_v13 = vpop.permute.xlu0 %325  ;;  %v418_v28 = vmul.f32 %v402_v10, %v370_v47 }
  0x91   :  { %v1037_v17 = vmul.f32 %v1828_v61, %v2431_v40  ;;  %v1830_v48 = vpop.eup %1829 }
  0x92   :  { %689 = vperm.xlu1 %1824, %v2302_v35   ;;  %531 = vrot.lane.b32.xlu0 %v446_v23, %s1992_s26  ;;  %v356_v35 = vsub.f32 %v2185_v34, %v320_v38  ;;  %v403_v23 = vmul.f32 0.5, %v371_v55  ;;  %v373_v38 = vand.u32 2147483647, %v357_v16  ;;  %v450_v56 = vsel %vm386_vm13, %v418_v28, %v1805_v14 }
  0x93   :  { %v1053_v52 = vsel %vm1021_vm12, %v1828_v61, %v1037_v17  ;;  %v374_v61 = vand.u32 2147483647, %v358_v39  ;;  %v1127_v62 = vmul.f32 0.6931472, %v1830_v48  ;;  %v328_v17 = vpop.permute.xlu1 %327 }
  0x94   :  { %v372_v57 = vand.u32 2147483647, %v356_v35  ;;  %v1808_v37 = vadd.f32 -0.5, %v373_v38  ;;  %vm389_vm3 = vcmp.lt.f32.partialorder %v373_v38, 1.0 }
  0x95   :  { %vm390_vm4 = vcmp.lt.f32.partialorder %v374_v61, 1.0 }
  0x96   :  { %692 = vperm.xlu1 %1824, %v2313_v44   ;;  %533 = vrot.lane.b32.xlu0 %v447_v29, %s1992_s26  ;;  %v1128_v44 = vmul.f32 -0.5, %v2431_v40  ;;  %v1806_v29 = vadd.f32 -0.5, %v371_v55  ;;  %v404_v53 = vmul.f32 0.5, %v372_v57  ;;  %vm388_vm2 = vcmp.lt.f32.partialorder %v372_v57, 1.0 }
  0x98   :  { %v1129_v30 = vadd.f32 1.0, %v1128_v44 }
  0x9a   :  { %695 = vperm.xlu1 %1824, %v2317_v46   ;;  %535 = vrot.lane.b32.xlu0 %v448_v54, %s1992_s26  ;;  %v2460_v46 = vand.u32 127, %v842_v11  ;;  %v1130_v47 = vmul.f32 %v2431_v40, %v1129_v30  ;;  %v1807_v54 = vadd.f32 -0.5, %v372_v57  ;;  %v420_v40 = vmul.f32 %v404_v53, %v372_v57 }
  0x9b   :  { %v360_v30 = vsub.f32 %v2291_v25, %v328_v17 }
  0x9c   :  { %3526 = vst [vmem:[#allocation8_spill] sm:$0xff] %v2460_v46 }
  0x9d   :  { %v2456_v36 = vpop.permute.xlu0 %650  ;;  %v2505_v17 = vpop.permute.xlu1 %653 }
  0x9e   :  { %845 = vperm.xlu1 %1824, %v2170_v31   ;;  %537 = vrot.lane.b32.xlu0 %v449_v27, %s1992_s26  ;;  %v419_v31 = vmul.f32 %v403_v23, %v371_v55  ;;  %v359_v55 = vsub.f32 %v2286_v24, %v326_v13  ;;  %v405_v27 = vmul.f32 0.5, %v373_v38  ;;  %v452_v13 = vsel %vm388_vm2, %v420_v40, %v1807_v54 }
  0x9f   :  { %vm697_vm9 = vcmp.eq.s32.totalorder %v2456_v36, 1  ;;  %vm698_vm13 = vcmp.eq.s32.totalorder %v2505_v17, 1 }
  0xa0   :  { %v451_v63 = vsel %vm387_vm14, %v419_v31, %v1806_v29  ;;  %v375_v48 = vand.u32 2147483647, %v359_v55  ;;  %v421_v29 = vmul.f32 %v405_v27, %v373_v38 }
  0xa1   :  { %v849_v35 = vpop.permute.xlu0 %848 }
  0xa2   :  { %851 = vperm.xlu1 %1824, %v2109_v12   ;;  %539 = vrot.lane.b32.xlu0 %v450_v56, %s1992_s26  ;;  %vm893_vm10 = vcmp.eq.s32.totalorder %v2460_v46, %v849_v35  ;;  %v453_v31 = vsel %vm389_vm3, %v421_v29, %v1808_v37  ;;  %v1809_v35 = vadd.f32 -0.5, %v374_v61  ;;  %vm391_vm5 = vcmp.lt.f32.partialorder %v375_v48, 1.0 }
  0xa3   :  { %v909_v10 = vsel %vm893_vm10, 1.0, %v3489_v5  ;;  %v459_v37 = vsub.f32 0.0, %v2022_v1  ;;  %v464_v29 = vsub.f32 0.0, %v2098_v9  ;;  %v2535_v9 = vld [vmem:[%s3486_s1 + $0x30] sm:$0xff]  ;;  %v2691_v46 = vmul.f32 0.5, %v2185_v34 }
  0xa4   :  { %v1085_v11 = vmul.f32 %v909_v10, %v2419_v4  ;;  %v1277_v44 = vsub.f32 %v909_v10, %v1053_v52  ;;  %v1309_v12 = vmul.f32 0.25, %v909_v10  ;;  %v1325_v14 = vsub.f32 1.0, %v909_v10 }
  0xa5   :  { %v1133_v4 = vsel %vm2470_vm15, %v1130_v47, %v1127_v62  ;;  %v406_v52 = vmul.f32 0.5, %v374_v61  ;;  %v407_v47 = vmul.f32 0.5, %v375_v48  ;;  %3543 = vst [vmem:[#allocation21_spill] sm:$0xff] %v2691_v46 }
  0xa6   :  { %857 = vperm.xlu1 %1824, %v2127_v18   ;;  %541 = vrot.lane.b32.xlu0 %v451_v63, %s1992_s26  ;;  %v1101_v16 = vsub.f32 %v1069_v45, %v1085_v11  ;;  %v1293_v28 = vand.u32 2147483647, %v1277_v44  ;;  %v1341_v23 = vmul.f32 0.75, %v1325_v14  ;;  %v376_v45 = vand.u32 2147483647, %v360_v30 }
  0xa7   :  { %v422_v53 = vmul.f32 %v406_v52, %v374_v61  ;;  %v423_v10 = vmul.f32 %v407_v47, %v375_v48  ;;  %v1810_v11 = vadd.f32 -0.5, %v375_v48  ;;  %v458_v30 = vsub.f32 0.0, %v2031_v2  ;;  %v2544_v47 = vld [vmem:[%s3486_s1 + $0x40] sm:$0xff] }
  0xa8   :  { %v1357_v39 = vadd.f32 %v1341_v23, %v1309_v12  ;;  %v1261_v18 = vadd.f32 %v1133_v4, %v1101_v16  ;;  %v408_v38 = vmul.f32 0.5, %v376_v45  ;;  %v1811_v14 = vadd.f32 -0.5, %v376_v45  ;;  %v2510_v4 = vpop.permute.xlu1 %656 }
  0xa9   :  { %v455_v44 = vsel %vm391_vm5, %v423_v10, %v1810_v11  ;;  %vm392_vm6 = vcmp.lt.f32.partialorder %v376_v45, 1.0  ;;  %v457_v23 = vsub.f32 0.0, %v2017_v0  ;;  %v461_v48 = vsub.f32 0.0, %v2079_v6 }
  0xaa   :  { %863 = vperm.xlu1 %1824, %v2155_v26   ;;  %543 = vrot.lane.b32.xlu0 %v452_v13, %s1992_s26  ;;  %v1373_v57 = vmul.f32 %v1357_v39, %v1293_v28  ;;  %v454_v26 = vsel %vm390_vm4, %v422_v53, %v1809_v35  ;;  %v424_v12 = vmul.f32 %v408_v38, %v376_v45  ;;  %v462_v0 = vsub.f32 0.0, %v2084_v7 }
  0xab   :  { %v473_v39 = vmul.f32 1.442695, %v457_v23  ;;  %v477_v2 = vmul.f32 1.442695, %v459_v37  ;;  %v463_v13 = vsub.f32 0.0, %v2093_v8  ;;  %v467_v8 = vsub.f32 0.0, %v2180_v33 }
  0xac   :  { %v1389_v56 = vmul.f32 %v1373_v57, %v1293_v28  ;;  %v456_v61 = vsel %vm392_vm6, %v424_v12, %v1811_v14  ;;  %v2524_v1 = vpop.permute.xlu1 %659  ;;  %v481_v52 = vmul.f32 1.442695, %v461_v48  ;;  %v466_v57 = vsub.f32 0.0, %v2137_v20 }
  0xad   :  { %v485_v45 = vmul.f32 1.442695, %v463_v13  ;;  %v932_v11 = vand.u32 2147483647, %v2544_v47  ;;  %vm699_vm14 = vcmp.eq.s32.totalorder %v2510_v4, 1  ;;  %vm700_vm15 = vcmp.eq.s32.totalorder %v2524_v1, 1 }
  0xae   :  { %869 = vperm.xlu1 %1824, %v2198_v41   ;;  %545 = vrot.lane.b32.xlu0 %v453_v31, %s1992_s26  ;;  %v1405_v54 = vmul.f32 %v1389_v56, %v1261_v18  ;;  %v2494_v41 = vld [vmem:[%s3486_s1] sm:$0xff]  ;;  %v483_v18 = vmul.f32 1.442695, %v462_v0  ;;  %v487_v56 = vmul.f32 1.442695, %v464_v29  ;;  %v468_v31 = vsub.f32 0.0, %v2185_v34 }
  0xaf   :  { %3529 = vst [vmem:[#allocation9_spill] sm:$0xff] %v2494_v41  ;;  %v924_v63 = vand.u32 2147483647, %v2494_v41  ;;  %v472_v0 = vsub.f32 0.0, %v2291_v25  ;;  %vm1020_vm7 = vcmp.ge.f32.partialorder %v2494_v41, 0.0  ;;  %vm1026_vm4 = vcmp.ge.f32.partialorder %v2535_v9, 0.0 }
  0xb0   :  { %v1485_v62 = vadd.f32 %v1421_v58, %v1405_v54  ;;  %v2539_v53 = vpop.permute.xlu1 %662  ;;  %v491_v58 = vmul.f32 1.442695, %v466_v57  ;;  %v930_v54 = vand.u32 2147483647, %v2535_v9  ;;  %v495_v10 = vmul.f32 1.442695, %v468_v31 }
  0xb1   :  { %v940_v40 = vsub.f32 0.0, %v924_v63  ;;  %v469_v63 = vsub.f32 0.0, %v2208_v43  ;;  %vm701_vm3 = vcmp.eq.s32.totalorder %v2539_v53, 1  ;;  %vm1028_vm6 = vcmp.ge.f32.partialorder %v2544_v47, 0.0 }
  0xb2   :  { %875 = vperm.xlu1 %1824, %v2227_v49   ;;  %547 = vrot.lane.b32.xlu0 %v454_v26, %s1992_s26  ;;  %1501 = vst.msk [vmem:[#allocation3 + $0x8] sm:$0xff] %vm115_vm1, %v1485_v62  ;;  %v2500_v49 = vld [vmem:[%s3486_s1 + $0x10] sm:$0xff]  ;;  %v493_v26 = vmul.f32 1.442695, %v467_v8  ;;  %v946_v14 = vsub.f32 0.0, %v930_v54 }
  0xb3   :  { %v926_v55 = vand.u32 2147483647, %v2500_v49  ;;  %v956_v16 = vmul.f32 1.442695, %v940_v40  ;;  %v503_v8 = vmul.f32 1.442695, %v472_v0 }
  0xb4   :  { %v968_v23 = vmul.f32 1.442695, %v946_v14  ;;  %vm1022_vm11 = vcmp.ge.f32.partialorder %v2500_v49, 0.0 }
  0xb5   :  { %v942_v27 = vsub.f32 0.0, %v926_v55  ;;  %1831 = vpow2.f32 %v956_v16  ;;  %v2561_v55 = vpop.permute.xlu1 %665  ;;  %v470_v16 = vsub.f32 0.0, %v2237_v51 }
  0xb6   :  { %549 = vrot.lane.b32.xlu0 %v455_v44, %s1992_s26 }
  0xb7   :  { %v960_v28 = vmul.f32 1.442695, %v942_v27  ;;  %v948_v27 = vsub.f32 0.0, %v932_v11 }
  0xb9   :  { %1833 = vpow2.f32 %v960_v28  ;;  %v2587_v29 = vpop.permute.xlu1 %668 }
  0xba   :  { %551 = vrot.lane.b32.xlu0 %v456_v61, %s1992_s26  ;;  %1835 = vpow2.f32 %v473_v39  ;;  %v471_v39 = vsub.f32 0.0, %v2286_v24 }
  0xbc   :  { %v501_v57 = vmul.f32 1.442695, %v471_v39 }
  0xbe   :  { %854 = vperm.xlu0 %1823, %v2117_v15   ;;  %v460_v15 = vsub.f32 0.0, %v2036_v3 }
  0xc0   :  { %v479_v3 = vmul.f32 1.442695, %v460_v15  ;;  %v497_v15 = vmul.f32 1.442695, %v469_v63  ;;  %v1954_v63 = vld [vmem:[%s3485_s0 + $0x8] sm:$0xff] }
  0xc2   :  { %860 = vperm.xlu0 %1823, %v2146_v22   ;;  %v475_v22 = vmul.f32 1.442695, %v458_v30  ;;  %v2547_v62 = vpop.eup %1831 }
  0xc3   :  { %v988_v12 = vadd.f32 1.0, %v2547_v62 }
  0xc4   :  { %1837 = vpow2.f32 %v475_v22  ;;  %v2580_v22 = vld [vmem:[%s3486_s1 + $0x28] sm:$0xff] }
  0xc5   :  { %1839 = vpow2.f32 %v477_v2  ;;  %3531 = vst [vmem:[#allocation11_spill] sm:$0xff] %v2580_v22  ;;  %v972_v2 = vmul.f32 1.442695, %v948_v27  ;;  %v1955_v27 = vld [vmem:[%s3485_s0 + $0x10] sm:$0xff] }
  0xc6   :  { %866 = vperm.xlu0 %1823, %v2175_v32   ;;  %v2521_v32 = vld [vmem:[%s3486_s1 + $0x20] sm:$0xff]  ;;  %1841 = vpow2.f32 %v479_v3  ;;  %v2555_v38 = vpop.eup %1833  ;;  %v499_v3 = vmul.f32 1.442695, %v470_v16  ;;  %v2628_v16 = vmul.f32 0.5, %v1955_v27  ;;  %v2661_v27 = vmul.f32 0.5, %v2137_v20 }
  0xc7   :  { %v928_v7 = vand.u32 2147483647, %v2521_v32  ;;  %1843 = vpow2.f32 %v481_v52  ;;  %v990_v40 = vadd.f32 1.0, %v2555_v38  ;;  %v2571_v28 = vpop.eup %1835  ;;  %vm1024_vm10 = vcmp.ge.f32.partialorder %v2521_v32, 0.0 }
  0xc8   :  { %1845 = vpow2.f32 %v483_v18  ;;  %3537 = vst [vmem:[#allocation17_spill] sm:$0xff] %v2661_v27 }
  0xc9   :  { %v944_v35 = vsub.f32 0.0, %v928_v7  ;;  %1847 = vpow2.f32 %v485_v45  ;;  %v929_v7 = vand.u32 2147483647, %v2580_v22 }
  0xca   :  { %872 = vperm.xlu0 %1823, %v2203_v42   ;;  %v465_v42 = vsub.f32 0.0, %v2132_v19  ;;  %1849 = vpow2.f32 %v487_v56  ;;  %v2599_v56 = vld [vmem:[%s3486_s1 + $0x38] sm:$0xff] }
  0xcb   :  { %v964_v44 = vmul.f32 1.442695, %v944_v35  ;;  %3532 = vst [vmem:[#allocation12_spill] sm:$0xff] %v2599_v56  ;;  %v1119_v35 = vmul.f32 -0.5, %v2547_v62  ;;  %v931_v11 = vand.u32 2147483647, %v2599_v56 }
  0xcd   :  { %v1120_v0 = vadd.f32 1.0, %v1119_v35  ;;  %v1959_v35 = vld [vmem:[%s3485_s0 + $0x38] sm:$0xff] }
  0xce   :  { %878 = vperm.xlu0 %1823, %v2232_v50   ;;  %v489_v50 = vmul.f32 1.442695, %v465_v42 }
  0xcf   :  { %v2677_v5 = vmul.f32 %v2547_v62, %v1120_v0 }
  0xd0   :  { %1851 = vpow2.f32 %v489_v50 }
  0xd1   :  { %1853 = vpow2.f32 %v491_v58  ;;  %v2573_v37 = vpop.eup %1837  ;;  %v945_v58 = vsub.f32 0.0, %v929_v7  ;;  %v1957_v7 = vld [vmem:[%s3485_s0 + $0x28] sm:$0xff] }
  0xd2   :  { %881 = vperm.xlu0 %1823, %v2252_v59   ;;  %v2552_v59 = vld [vmem:[%s3486_s1 + $0x50] sm:$0xff]  ;;  %1855 = vpow2.f32 %v493_v26  ;;  %v2608_v26 = vpop.permute.xlu1 %671 }
  0xd3   :  { %v934_v61 = vand.u32 2147483647, %v2552_v59  ;;  %1857 = vpow2.f32 %v495_v10 }
  0xd4   :  { %1859 = vpow2.f32 %v964_v44 }
  0xd5   :  { %1861 = vrcp.f32 %v988_v12  ;;  %v950_v30 = vsub.f32 0.0, %v934_v61 }
  0xd6   :  { %884 = vperm.xlu0 %1823, %v2257_v60   ;;  %v2567_v60 = vld [vmem:[%s3486_s1 + $0x18] sm:$0xff]  ;;  %1863 = vlog2.f32 %v988_v12  ;;  %v1953_v12 = vld [vmem:[%s3485_s0] sm:$0xff] }
  0xd7   :  { %3530 = vst [vmem:[#allocation10_spill] sm:$0xff] %v2567_v60  ;;  %v927_v48 = vand.u32 2147483647, %v2567_v60  ;;  %1865 = vrcp.f32 %v990_v40  ;;  %v976_v42 = vmul.f32 1.442695, %v950_v30  ;;  %v2616_v14 = vmul.f32 0.5, %v1953_v12 }
  0xd8   :  { %1867 = vlog2.f32 %v990_v40  ;;  %v2623_v40 = vmul.f32 0.5, %v1954_v63  ;;  %v2658_v63 = vmul.f32 0.5, %v2132_v19  ;;  %v2674_v19 = vld [vmem:[%s3486_s1 + $0x48] sm:$0xff] }
  0xd9   :  { %1869 = vpow2.f32 %v968_v23  ;;  %v943_v45 = vsub.f32 0.0, %v927_v48  ;;  %v1956_v23 = vld [vmem:[%s3485_s0 + $0x18] sm:$0xff]  ;;  %v2639_v48 = vmul.f32 0.5, %v2079_v6  ;;  %v947_v6 = vsub.f32 0.0, %v931_v11  ;;  %3539 = vst [vmem:[#allocation19_spill] sm:$0xff] %v2674_v19 }
  0xda   :  { %887 = vperm.xlu0 %1823, %v2278_v21   ;;  %v2582_v21 = vpop.eup %1839  ;;  %1871 = vpow2.f32 %v497_v15  ;;  %v2633_v30 = vmul.f32 0.5, %v1956_v23  ;;  %v1137_v15 = vmul.f32 -0.5, %v2555_v38  ;;  %3536 = vst [vmem:[#allocation16_spill] sm:$0xff] %v2658_v63  ;;  %v2664_v23 = vmul.f32 0.5, %v2180_v33  ;;  %v1420_v33 = vld [vmem:[#allocation3] sm:$0xff] }
  0xdb   :  { %v2585_v13 = vpop.eup %1841  ;;  %1873 = vpow2.f32 %v972_v2  ;;  %v962_v10 = vmul.f32 1.442695, %v943_v45  ;;  %v1122_v2 = vand.u32 2147483647, %v2547_v62  ;;  %v1958_v45 = vld [vmem:[%s3485_s0 + $0x30] sm:$0xff] }
  0xdc   :  { %v2589_v52 = vpop.eup %1843  ;;  %1875 = vpow2.f32 %v499_v3  ;;  %v966_v3 = vmul.f32 1.442695, %v945_v58  ;;  %v2655_v58 = vmul.f32 0.5, %v1959_v35  ;;  %3538 = vst [vmem:[#allocation18_spill] sm:$0xff] %v2664_v23  ;;  %v1138_v11 = vadd.f32 1.0, %v1137_v15 }
  0xdd   :  { %v2592_v18 = vpop.eup %1845  ;;  %1877 = vpow2.f32 %v976_v42  ;;  %vm2679_vm8 = vcmp.lt.f32.partialorder %v1122_v2, 0.0004427343  ;;  %v970_v0 = vmul.f32 1.442695, %v947_v6  ;;  %v933_v27 = vand.u32 2147483647, %v2674_v19 }
  0xde   :  { %v2594_v25 = vpop.eup %1847  ;;  %1879 = vpow2.f32 %v501_v57  ;;  %v2645_v57 = vmul.f32 0.5, %v1957_v7  ;;  %v3549_v2 = vmov 0  ;;  %v2738_v19 = vmul.f32 0.5, %v2237_v51 }
  0xdf   :  { %v2601_v31 = vpop.eup %1849  ;;  %1881 = vpow2.f32 %v503_v8  ;;  %v2650_v8 = vmul.f32 0.5, %v1958_v45  ;;  %v2666_v45 = vpop.permute.xlu1 %674  ;;  %v949_v41 = vsub.f32 0.0, %v933_v27  ;;  %v2758_v27 = vld [vmem:[%s3486_s1 + $0x60] sm:$0xff] }
  0xe0   :  { %v2603_v50 = vpop.eup %1851  ;;  %1883 = vpow2.f32 %v962_v10  ;;  %3553 = vst [vmem:[#allocation29_spill] sm:$0xff] %v2738_v19  ;;  %v2784_v19 = vld [vmem:[%s3486_s1 + $0x70] sm:$0xff] }
  0xe1   :  { %v2606_v54 = vpop.eup %1853  ;;  %1885 = vpow2.f32 %v966_v3  ;;  %v2698_v3 = vmul.f32 0.5, %v2208_v43  ;;  %3557 = vst [vmem:[#allocation33_spill] sm:$0xff] %v2784_v19 }
  0xe2   :  { %3533 = vst [vmem:[#allocation13_spill] sm:$0xff] %v2606_v54  ;;  %v2611_v44 = vpop.eup %1855 }
  0xe3   :  { %3534 = vst [vmem:[#allocation14_spill] sm:$0xff] %v2611_v44  ;;  %v2618_v61 = vpop.eup %1857  ;;  %3545 = vst [vmem:[#allocation23_spill] sm:$0xff] %v2698_v3  ;;  %v2720_v3 = vld [vmem:[%s3486_s1 + $0x58] sm:$0xff] }
  0xe4   :  { %3535 = vst [vmem:[#allocation15_spill] sm:$0xff] %v2618_v61  ;;  %v2636_v39 = vpop.eup %1859  ;;  %v1140_v61 = vand.u32 2147483647, %v2555_v38 }
  0xe5   :  { %v1862_v42 = vpop.eup %1861  ;;  %v992_v35 = vadd.f32 1.0, %v2636_v39  ;;  %v1155_v34 = vmul.f32 -0.5, %v2636_v39 }
  0xe6   :  { %v1864_v12 = vpop.eup %1863  ;;  %v1036_v15 = vmul.f32 %v1862_v42, %v2547_v62  ;;  %vm2712_vm12 = vcmp.lt.f32.partialorder %v1140_v61, 0.0004427343 }
  0xe7   :  { %v1866_v7 = vpop.eup %1865  ;;  %v2688_v23 = vmul.f32 0.6931472, %v1864_v12  ;;  %v2705_v12 = vmul.f32 %v2555_v38, %v1138_v11  ;;  %1887 = vrcp.f32 %v992_v35  ;;  %v3550_v2 = vsel %vm2712_vm12, 4294967295, %v3549_v2 }
  0xe8   :  { %v1868_v20 = vpop.eup %1867  ;;  %v1038_v62 = vmul.f32 %v1866_v7, %v2555_v38  ;;  %3551 = vst [vmem:[#allocation27_spill] sm:$0xff] %v3550_v2  ;;  %1889 = vlog2.f32 %v992_v35  ;;  %v1156_v61 = vadd.f32 1.0, %v1155_v34  ;;  %v2769_v34 = vld [vmem:[%s3486_s1 + $0x68] sm:$0xff] }
  0xe9   :  { %v2684_v10 = vpop.eup %1869  ;;  %3542 = vst [vmem:[#allocation20_spill] sm:$0xff] %v2688_v23  ;;  %3546 = vst [vmem:[#allocation24_spill] sm:$0xff] %v2705_v12  ;;  %1891 = vpow2.f32 %v970_v0  ;;  %v935_v0 = vand.u32 2147483647, %v2720_v3 }
  0xea   :  { %v2693_v44 = vpop.eup %1871  ;;  %v994_v43 = vadd.f32 1.0, %v2684_v10  ;;  %3556 = vst [vmem:[#allocation32_spill] sm:$0xff] %v2769_v34  ;;  %v1176_v36 = vand.u32 2147483647, %v2684_v10 }
  0xeb   :  { %3544 = vst [vmem:[#allocation22_spill] sm:$0xff] %v2693_v44  ;;  %v2701_v54 = vpop.eup %1873  ;;  %v2710_v44 = vmul.f32 0.6931472, %v1868_v20  ;;  %v2727_v20 = vsel %vm1020_vm7, %v1862_v42, %v1036_v15  ;;  %v2745_v15 = vsel %vm1022_vm11, %v1866_v7, %v1038_v62  ;;  %v1158_v62 = vand.u32 2147483647, %v2636_v39 }
  0xec   :  { %v2708_v6 = vpop.eup %1875  ;;  %v996_v63 = vadd.f32 1.0, %v2701_v54  ;;  %1893 = vrcp.f32 %v994_v43  ;;  %vm2829_vm5 = vcmp.lt.f32.partialorder %v1176_v36, 0.0004427343  ;;  %vm702_vm7 = vcmp.eq.s32.totalorder %v2561_v55, 1 }
  0xed   :  { %3547 = vst [vmem:[#allocation25_spill] sm:$0xff] %v2708_v6  ;;  %3548 = vst [vmem:[#allocation26_spill] sm:$0xff] %v2710_v44  ;;  %v2722_v38 = vpop.eup %1877  ;;  %1895 = vlog2.f32 %v994_v43  ;;  %v2778_v43 = vmul.f32 %v2636_v39, %v1156_v61  ;;  %vm2798_vm2 = vcmp.lt.f32.partialorder %v1158_v62, 0.0004427343  ;;  %vm1030_vm11 = vcmp.ge.f32.partialorder %v2552_v59, 0.0 }
  0xee   :  { %v2734_v6 = vpop.eup %1879  ;;  %1897 = vrcp.f32 %v996_v63  ;;  %v1212_v2 = vand.u32 2147483647, %v2722_v38 }
  0xef   :  { %3552 = vst [vmem:[#allocation28_spill] sm:$0xff] %v2734_v6  ;;  %v2741_v42 = vpop.eup %1881  ;;  %1899 = vlog2.f32 %v996_v63 }
  0xf0   :  { %v522_v11 = vpop.permute.xlu1 %521  ;;  %3554 = vst [vmem:[#allocation30_spill] sm:$0xff] %v2741_v42  ;;  %v974_v42 = vmul.f32 1.442695, %v949_v41  ;;  %v937_v41 = vand.u32 2147483647, %v2769_v34 }
  0xf1   :  { %v569_v46 = vmul.f32 %v2571_v28, %v522_v11  ;;  %v998_v28 = vadd.f32 1.0, %v2722_v38  ;;  %v2771_v11 = vpop.eup %1883  ;;  %v938_v34 = vand.u32 2147483647, %v2784_v19 }
  0xf3   :  { %v601_v6 = vadd.f32 %v2616_v14, %v569_v46  ;;  %v1173_v46 = vmul.f32 -0.5, %v2684_v10  ;;  %v2764_v14 = vmul.f32 0.5, %v2286_v24  ;;  %v951_v24 = vsub.f32 0.0, %v935_v0 }
  0xf4   :  { %v524_v7 = vpop.permute.xlu0 %523  ;;  %1901 = vrcp.f32 %v998_v28  ;;  %v1191_v0 = vmul.f32 -0.5, %v2701_v54 }
  0xf5   :  { %3555 = vst [vmem:[#allocation31_spill] sm:$0xff] %v2764_v14  ;;  %v570_v35 = vmul.f32 %v2573_v37, %v524_v7  ;;  %v713_v51 = vsel %vm697_vm9, %v601_v6, 0.0  ;;  %v936_v14 = vand.u32 2147483647, %v2758_v27  ;;  %v2789_v6 = vpop.eup %1885  ;;  %v1174_v61 = vadd.f32 1.0, %v1173_v46  ;;  %v1960_v46 = vld [vmem:[%s3487_s2 + $0x78] sm:$0xff] }
  0xf6   :  { %745 = vrot.lane.b32.xlu0 %v713_v51, %s1992_s26  ;;  %1903 = vlog2.f32 %v998_v28  ;;  %v991_v51 = vadd.f32 1.0, %v2771_v11  ;;  %v978_v17 = vmul.f32 1.442695, %v951_v24  ;;  %v1888_v62 = vpop.eup %1887  ;;  %v993_v44 = vadd.f32 1.0, %v2789_v6 }
  0xf7   :  { %v602_v37 = vadd.f32 %v2623_v40, %v570_v35  ;;  %1905 = vpow2.f32 %v974_v42  ;;  %v1961_v42 = vld [vmem:[%s3485_s0 + $0x78] sm:$0xff]  ;;  %v1890_v12 = vpop.eup %1889  ;;  %v1192_v24 = vadd.f32 1.0, %v1191_v0  ;;  %v1167_v55 = vand.u32 2147483647, %v2789_v6 }
  0xf8   :  { %v526_v63 = vpop.permute.xlu0 %525  ;;  %v2813_v19 = vmul.f32 0.5, %v1961_v42  ;;  %1907 = vrcp.f32 %v991_v51 }
  0xf9   :  { %v571_v40 = vmul.f32 %v2582_v21, %v526_v63  ;;  %v714_v35 = vsel %vm698_vm13, %v602_v37, 0.0  ;;  %v1209_v21 = vmul.f32 -0.5, %v2722_v38  ;;  %v952_v37 = vsub.f32 0.0, %v936_v14 }
  0xfa   :  { %890 = vperm.xlu0 %1823, %v1960_v46   ;;  %747 = vrot.lane.b32.xlu1 %v714_v35, %s1992_s26  ;;  %3560 = vst [vmem:[#allocation34_spill] sm:$0xff] %v2813_v19  ;;  %v953_v46 = vsub.f32 0.0, %v937_v41  ;;  %v2819_v14 = vmul.f32 %v2684_v10, %v1174_v61  ;;  %1909 = vlog2.f32 %v991_v51  ;;  %v954_v61 = vsub.f32 0.0, %v938_v34 }
  0xfb   :  { %v603_v63 = vadd.f32 %v2628_v16, %v571_v40  ;;  %v1194_v16 = vand.u32 2147483647, %v2701_v54  ;;  %v2822_v40 = vpop.eup %1891  ;;  %v1210_v0 = vadd.f32 1.0, %v1209_v21  ;;  %1911 = vpow2.f32 %v978_v17 }
  0xfc   :  { %v528_v35 = vpop.permute.xlu0 %527  ;;  %v980_v23 = vmul.f32 1.442695, %v952_v37  ;;  %1913 = vrcp.f32 %v993_v44  ;;  %v982_v4 = vmul.f32 1.442695, %v953_v46  ;;  %v1894_v36 = vpop.eup %1893  ;;  %v2839_v34 = vmul.f32 0.6931472, %v1890_v12 }
  0xfd   :  { %v572_v42 = vmul.f32 %v2585_v13, %v528_v35  ;;  %v2825_v28 = vpop.permute.xlu1 %677  ;;  %v715_v41 = vsel %vm699_vm14, %v603_v63, 0.0  ;;  %v1040_v35 = vmul.f32 %v1888_v62, %v2636_v39  ;;  %v2842_v21 = vmul.f32 %v2701_v54, %v1192_v24  ;;  %v1896_v37 = vpop.eup %1895 }
  0xfe   :  { %749 = vrot.lane.b32.xlu1 %v715_v41, %s1992_s26  ;;  %vm2844_vm9 = vcmp.lt.f32.partialorder %v1194_v16, 0.0004427343  ;;  %v995_v39 = vadd.f32 1.0, %v2822_v40  ;;  %1915 = vlog2.f32 %v993_v44  ;;  %v984_v24 = vmul.f32 1.442695, %v954_v61  ;;  %v1898_v16 = vpop.eup %1897 }
  0xff   :  { %v604_v13 = vadd.f32 %v2633_v30, %v572_v42  ;;  %3563 = vst [vmem:[#allocation35_spill] sm:$0xff] %v2842_v21  ;;  %v2858_v42 = vmul.f32 %v2722_v38, %v1210_v0  ;;  %vm2860_vm13 = vcmp.lt.f32.partialorder %v1212_v2, 0.0004427343  ;;  %v3567_v41 = vmov 0 }
 0x100   :  { %v530_v51 = vpop.permute.xlu0 %529  ;;  %v3568_v41 = vsel %vm2860_vm13, 4294967295, %v3567_v41  ;;  %v1146_v30 = vmul.f32 -0.5, %v2771_v11  ;;  %1917 = vpow2.f32 %v980_v23  ;;  %v2868_v1 = vsel %vm1024_vm10, %v1888_v62, %v1040_v35 }
 0x101   :  { %v573_v63 = vmul.f32 %v2589_v52, %v530_v51  ;;  %v2852_v46 = vpop.permute.xlu1 %680  ;;  %v716_v12 = vsel %vm700_vm15, %v604_v13, 0.0  ;;  %3566 = vst [vmem:[#allocation36_spill] sm:$0xff] %v2858_v42  ;;  %3569 = vst [vmem:[#allocation37_spill] sm:$0xff] %v3568_v41  ;;  %v1900_v52 = vpop.eup %1899  ;;  %v1042_v44 = vmul.f32 %v1894_v36, %v2684_v10  ;;  %1919 = vpow2.f32 %v982_v4  ;;  %v3629_v19 = vld [vmem:[#allocation34_spill] sm:$0xff] }
 0x102   :  { %751 = vrot.lane.b32.xlu1 %v716_v12, %s1992_s26  ;;  %v1902_v61 = vpop.eup %1901  ;;  %vm703_vm14 = vcmp.eq.s32.totalorder %v2587_v29, 1  ;;  %v2876_v23 = vmul.f32 0.6931472, %v1896_v37  ;;  %1921 = vrcp.f32 %v995_v39  ;;  %vm1023_vm15 = vcmp.ge.f32.partialorder %v2567_v60, 0.0 }
 0x103   :  { %v605_v51 = vadd.f32 %v2639_v48, %v573_v63  ;;  %v1164_v48 = vmul.f32 -0.5, %v2789_v6  ;;  %v1904_v13 = vpop.eup %1903  ;;  %v1149_v4 = vand.u32 2147483647, %v2771_v11  ;;  %1923 = vpow2.f32 %v984_v24 }
 0x104   :  { %v532_v2 = vpop.permute.xlu0 %531  ;;  %v2886_v63 = vpop.eup %1905  ;;  %v1044_v37 = vmul.f32 %v1898_v16, %v2701_v54  ;;  %v1147_v0 = vadd.f32 1.0, %v1146_v30  ;;  %1925 = vlog2.f32 %v995_v39  ;;  %v2894_v53 = vsel %vm1026_vm4, %v1894_v36, %v1042_v44 }
 0x105   :  { %v574_v62 = vmul.f32 %v2592_v18, %v532_v2  ;;  %v2880_v35 = vpop.permute.xlu1 %683  ;;  %v717_v10 = vsel %vm701_vm3, %v605_v51, 0.0  ;;  %v2896_v51 = vmul.f32 0.6931472, %v1900_v52  ;;  %v1046_v24 = vmul.f32 %v1902_v61, %v2722_v38 }
 0x106   :  { %753 = vrot.lane.b32.xlu1 %v717_v10, %s1992_s26  ;;  %vm704_vm10 = vcmp.eq.s32.totalorder %v2608_v26, 1  ;;  %v2904_v30 = vmul.f32 0.6931472, %v1904_v13  ;;  %v1165_v39 = vadd.f32 1.0, %v1164_v48  ;;  %vm2912_vm3 = vcmp.lt.f32.partialorder %v1149_v4, 0.0004427343 }
 0x107   :  { %v606_v18 = vadd.f32 %v2645_v57, %v574_v62  ;;  %3570 = vst [vmem:[#allocation38_spill] sm:$0xff] %v2896_v51  ;;  %v1182_v57 = vmul.f32 -0.5, %v2822_v40  ;;  %v1908_v62 = vpop.eup %1907  ;;  %v3572_v44 = vmov 0  ;;  %v997_v10 = vadd.f32 1.0, %v2886_v63 }
 0x108   :  { %v534_v2 = vpop.permute.xlu0 %533  ;;  %3571 = vst [vmem:[#allocation39_spill] sm:$0xff] %v2904_v30  ;;  %v3573_v44 = vsel %vm2912_vm3, 4294967295, %v3572_v44  ;;  %v1910_v12 = vpop.eup %1909  ;;  %v2920_v48 = vsel %vm1028_vm6, %v1898_v16, %v1044_v37  ;;  %vm1025_vm4 = vcmp.ge.f32.partialorder %v2580_v22, 0.0  ;;  %v2936_v16 = vsel %vm1030_vm11, %v1902_v61, %v1046_v24 }
 0x109   :  { %v575_v36 = vmul.f32 %v2594_v25, %v534_v2  ;;  %v2908_v52 = vpop.permute.xlu1 %686  ;;  %v718_v38 = vsel %vm702_vm7, %v606_v18, 0.0  ;;  %3574 = vst [vmem:[#allocation40_spill] sm:$0xff] %v3573_v44  ;;  %v2923_v25 = vmul.f32 %v2771_v11, %v1147_v0  ;;  %v2927_v13 = vpop.eup %1911  ;;  %vm705_vm6 = vcmp.eq.s32.totalorder %v2666_v45, 1 }
 0x10a   :  { %755 = vrot.lane.b32.xlu1 %v718_v38, %s1992_s26  ;;  %v1914_v37 = vpop.eup %1913  ;;  %v2946_v38 = vmul.f32 %v2789_v6, %v1165_v39  ;;  %v1183_v18 = vadd.f32 1.0, %v1182_v57  ;;  %v2953_v54 = vmul.f32 0.6931472, %v1910_v12  ;;  %1927 = vrcp.f32 %v997_v10 }
 0x10b   :  { %3575 = vst [vmem:[#allocation41_spill] sm:$0xff] %v2923_v25  ;;  %v607_v4 = vadd.f32 %v2650_v8, %v575_v36  ;;  %v1039_v36 = vmul.f32 %v1908_v62, %v2771_v11  ;;  %v1916_v51 = vpop.eup %1915  ;;  %vm2956_vm7 = vcmp.lt.f32.partialorder %v1167_v55, 0.0004427343  ;;  %v3578_v8 = vmov 0 }
 0x10c   :  { %v536_v2 = vpop.permute.xlu0 %535  ;;  %3576 = vst [vmem:[#allocation42_spill] sm:$0xff] %v2946_v38  ;;  %3577 = vst [vmem:[#allocation43_spill] sm:$0xff] %v2953_v54  ;;  %v3579_v8 = vsel %vm2956_vm7, 4294967295, %v3578_v8  ;;  %v1185_v11 = vand.u32 2147483647, %v2822_v40  ;;  %v1200_v39 = vmul.f32 -0.5, %v2886_v63  ;;  %v1041_v12 = vmul.f32 %v1914_v37, %v2789_v6 }
 0x10d   :  { %v576_v61 = vmul.f32 %v2601_v31, %v536_v2  ;;  %v2949_v24 = vpop.permute.xlu1 %689  ;;  %v719_v0 = vsel %vm703_vm14, %v607_v4, 0.0  ;;  %3580 = vst [vmem:[#allocation44_spill] sm:$0xff] %v3579_v8  ;;  %v999_v31 = vadd.f32 1.0, %v2927_v13  ;;  %v2963_v57 = vpop.eup %1917  ;;  %vm1027_vm11 = vcmp.ge.f32.partialorder %v2599_v56, 0.0 }
 0x10e   :  { %757 = vrot.lane.b32.xlu1 %v719_v0, %s1992_s26  ;;  %v2969_v55 = vpop.eup %1919  ;;  %v2973_v2 = vsel %vm1023_vm15, %v1908_v62, %v1039_v36  ;;  %v2976_v30 = vmul.f32 %v2822_v40, %v1183_v18  ;;  %1929 = vlog2.f32 %v997_v10  ;;  %v1218_v42 = vmul.f32 -0.5, %v2927_v13 }
 0x10f   :  { %v608_v29 = vadd.f32 %v2655_v58, %v576_v61  ;;  %3581 = vst [vmem:[#allocation45_spill] sm:$0xff] %v2973_v2  ;;  %v1922_v58 = vpop.eup %1921  ;;  %v2988_v36 = vmul.f32 0.6931472, %v1916_v51  ;;  %vm2993_vm14 = vcmp.lt.f32.partialorder %v1185_v11, 0.0004427343  ;;  %v3584_v10 = vmov 0 }
 0x110   :  { %v538_v0 = vpop.permute.xlu0 %537  ;;  %3582 = vst [vmem:[#allocation46_spill] sm:$0xff] %v2976_v30  ;;  %v2990_v18 = vpop.eup %1923  ;;  %v3585_v10 = vsel %vm2993_vm14, 4294967295, %v3584_v10  ;;  %1931 = vrcp.f32 %v999_v31  ;;  %v1000_v26 = vadd.f32 1.0, %v2963_v57  ;;  %v3001_v62 = vsel %vm1025_vm4, %v1914_v37, %v1041_v12  ;;  %v3589_v51 = vld [vmem:[#allocation19_spill] sm:$0xff]  ;;  %v3590_v2 = vld [vmem:[#allocation13_spill] sm:$0xff] }
 0x111   :  { %v577_v6 = vmul.f32 %v2603_v50, %v538_v0  ;;  %v2980_v61 = vpop.permute.xlu1 %692  ;;  %v720_v4 = vsel %vm704_vm10, %v608_v29, 0.0  ;;  %3583 = vst [vmem:[#allocation47_spill] sm:$0xff] %v2988_v36  ;;  %3586 = vst [vmem:[#allocation48_spill] sm:$0xff] %v3585_v10  ;;  %v1201_v50 = vadd.f32 1.0, %v1200_v39  ;;  %v1926_v29 = vpop.eup %1925  ;;  %v3587_v0 = vld [vmem:[#allocation16_spill] sm:$0xff]  ;;  %v1043_v11 = vmul.f32 %v1922_v58, %v2822_v40 }
 0x112   :  { %759 = vrot.lane.b32.xlu0 %v720_v4, %s1992_s26  ;;  %3588 = vst [vmem:[#allocation16_spill] sm:$0xff] %v3001_v62  ;;  %1933 = vlog2.f32 %v999_v31  ;;  %v1219_v44 = vadd.f32 1.0, %v1218_v42  ;;  %v1001_v39 = vadd.f32 1.0, %v2969_v55  ;;  %v1227_v12 = vmul.f32 -0.5, %v2963_v57 }
 0x113   :  { %v609_v60 = vadd.f32 %v3587_v0, %v577_v6  ;;  %v3018_v40 = vmul.f32 0.6931472, %v1926_v29  ;;  %v3021_v42 = vmul.f32 %v2886_v63, %v1201_v50  ;;  %1935 = vrcp.f32 %v1000_v26 }
 0x114   :  { %v540_v4 = vpop.permute.xlu0 %539  ;;  %v1002_v31 = vadd.f32 1.0, %v2990_v18  ;;  %1937 = vlog2.f32 %v1000_v26  ;;  %vm706_vm15 = vcmp.eq.s32.totalorder %v2825_v28, 1  ;;  %v3030_v29 = vsel %vm1027_vm11, %v1922_v58, %v1043_v11  ;;  %v3596_v26 = vld [vmem:[#allocation8_spill] sm:$0xff]  ;;  %v3597_v58 = vld [vmem:[#allocation18_spill] sm:$0xff]  ;;  %v3600_v28 = vld [vmem:[#allocation15_spill] sm:$0xff] }
 0x115   :  { %v578_v41 = vmul.f32 %v3590_v2, %v540_v4  ;;  %v3008_v21 = vpop.permute.xlu1 %695  ;;  %v721_v6 = vsel %vm705_vm6, %v609_v60, 0.0  ;;  %3591 = vst [vmem:[#allocation19_spill] sm:$0xff] %v3018_v40  ;;  %v3592_v2 = vld [vmem:[#allocation17_spill] sm:$0xff]  ;;  %3593 = vst [vmem:[#allocation13_spill] sm:$0xff] %v3030_v29  ;;  %v3033_v50 = vmul.f32 %v2927_v13, %v1219_v44  ;;  %1939 = vrcp.f32 %v1001_v39  ;;  %v3604_v29 = vld [vmem:[#allocation22_spill] sm:$0xff] }
 0x116   :  { %761 = vrot.lane.b32.xlu1 %v721_v6, %s1992_s26  ;;  %v3595_v6 = vld [vmem:[#allocation14_spill] sm:$0xff]  ;;  %1941 = vlog2.f32 %v1001_v39  ;;  %vm707_vm4 = vcmp.eq.s32.totalorder %v2852_v46, 1  ;;  %vm708_vm11 = vcmp.eq.s32.totalorder %v2880_v35, 1 }
 0x117   :  { %v610_v45 = vadd.f32 %v3592_v2, %v578_v41  ;;  %3594 = vst [vmem:[#allocation17_spill] sm:$0xff] %v3033_v50  ;;  %v1228_v2 = vadd.f32 1.0, %v1227_v12  ;;  %v3036_v60 = vpop.eup %1927  ;;  %1943 = vrcp.f32 %v1002_v31 }
 0x118   :  { %v542_v4 = vpop.permute.xlu0 %541  ;;  %1945 = vlog2.f32 %v1002_v31 }
 0x119   :  { %v579_v54 = vmul.f32 %v3595_v6, %v542_v4  ;;  %v846_v37 = vpop.permute.xlu1 %845  ;;  %v722_v41 = vsel %vm706_vm15, %v610_v45, 0.0  ;;  %v3598_v4 = vmov 0.0   ;;  %v3059_v31 = vmul.f32 %v2963_v57, %v1228_v2 }
 0x11a   :  { %vm892_vm10 = vcmp.eq.s32.totalorder %v3596_v26, %v846_v37  ;;  %763 = vrot.lane.b32.xlu0 %v722_v41, %s1992_s26  ;;  %v3599_v37 = vld [vmem:[#allocation9_spill] sm:$0xff]  ;;  %vm709_vm15 = vcmp.eq.s32.totalorder %v2908_v52, 1 }
 0x11b   :  { %v611_v11 = vadd.f32 %v3597_v58, %v579_v54  ;;  %v908_v45 = vsel %vm892_vm10, 1.0, %v3598_v4  ;;  %v3051_v25 = vpop.eup %1929  ;;  %v3056_v54 = vmul.f32 %v3036_v60, %v2886_v63  ;;  %3601 = vst [vmem:[#allocation14_spill] sm:$0xff] %v3059_v31  ;;  %v3602_v2 = vmax.f32 %v3599_v37, 0.0 }
 0x11c   :  { %v1084_v12 = vmul.f32 %v908_v45, %v3599_v37  ;;  %v1276_v6 = vsub.f32 %v908_v45, %v2727_v20  ;;  %v1324_v41 = vsub.f32 1.0, %v908_v45  ;;  %v544_v0 = vpop.permute.xlu0 %543  ;;  %v1308_v46 = vmul.f32 0.25, %v908_v45  ;;  %v3603_v45 = vld [vmem:[#allocation21_spill] sm:$0xff] }
 0x11d   :  { %v580_v44 = vmul.f32 %v3600_v28, %v544_v0  ;;  %v852_v40 = vpop.permute.xlu1 %851  ;;  %v723_v30 = vsel %vm707_vm4, %v611_v11, 0.0  ;;  %v3064_v20 = vmul.f32 -0.5, %v2969_v55  ;;  %v3069_v0 = vld [vmem:[%s3486_s1 + $0x78] sm:$0xff]  ;;  %v3071_v28 = vpop.eup %1931  ;;  %vm710_vm4 = vcmp.eq.s32.totalorder %v2949_v24, 1 }
 0x11e   :  { %v1340_v58 = vmul.f32 0.75, %v1324_v41  ;;  %vm894_vm6 = vcmp.eq.s32.totalorder %v3596_v26, %v852_v40  ;;  %765 = vrot.lane.b32.xlu1 %v723_v30, %s1992_s26  ;;  %v1100_v11 = vsub.f32 %v3602_v2, %v1084_v12  ;;  %v1292_v30 = vand.u32 2147483647, %v1276_v6 }
 0x11f   :  { %v612_v41 = vadd.f32 %v3603_v45, %v580_v44  ;;  %v910_v40 = vsel %vm894_vm6, 1.0, %v3598_v4  ;;  %v3080_v38 = vpop.eup %1933  ;;  %v3605_v12 = vmax.f32 %v2500_v49, 0.0  ;;  %vm712_vm6 = vcmp.eq.s32.totalorder %v3008_v21, 1  ;;  %v3635_v21 = vld [vmem:[#allocation35_spill] sm:$0xff] }
 0x120   :  { %v1356_v39 = vadd.f32 %v1340_v58, %v1308_v46  ;;  %v1086_v10 = vmul.f32 %v910_v40, %v2500_v49  ;;  %v1278_v56 = vsub.f32 %v910_v40, %v2745_v15  ;;  %v546_v36 = vpop.permute.xlu0 %545  ;;  %v1326_v8 = vsub.f32 1.0, %v910_v40  ;;  %v3089_v15 = vpop.eup %1935 }
 0x121   :  { %v581_v22 = vmul.f32 %v3604_v29, %v546_v36  ;;  %v858_v35 = vpop.permute.xlu1 %857  ;;  %v724_v62 = vsel %vm708_vm11, %v612_v41, 0.0  ;;  %v3606_v36 = vld [vmem:[#allocation20_spill] sm:$0xff]  ;;  %v1310_v58 = vmul.f32 0.25, %v910_v40  ;;  %v3098_v49 = vpop.eup %1937  ;;  %v3609_v41 = vld [vmem:[#allocation23_spill] sm:$0xff]  ;;  %v3611_v40 = vld [vmem:[#allocation25_spill] sm:$0xff]  ;;  %v3626_v24 = vsel %vm2829_vm5, %v2819_v14, %v2876_v23 }
 0x122   :  { %v1372_v44 = vmul.f32 %v1356_v39, %v1292_v30  ;;  %v1102_v6 = vsub.f32 %v3605_v12, %v1086_v10  ;;  %vm896_vm10 = vcmp.eq.s32.totalorder %v3596_v26, %v858_v35  ;;  %767 = vrot.lane.b32.xlu0 %v724_v62, %s1992_s26  ;;  %v3607_v29 = vsel %vm2679_vm8, %v2677_v5, %v3606_v36  ;;  %v3102_v37 = vpop.eup %1939 }
 0x123   :  { %v1260_v46 = vadd.f32 %v3607_v29, %v1100_v11  ;;  %v1342_v2 = vmul.f32 0.75, %v1326_v8  ;;  %v912_v39 = vsel %vm896_vm10, 1.0, %v3598_v4  ;;  %3608 = vst [vmem:[#allocation8_spill] sm:$0xff] %v3098_v49  ;;  %v1294_v45 = vand.u32 2147483647, %v1278_v56  ;;  %3610 = vst [vmem:[#allocation18_spill] sm:$0xff] %v3102_v37  ;;  %v3106_v29 = vpop.eup %1941 }
 0x124   :  { %v1388_v10 = vmul.f32 %v1372_v44, %v1292_v30  ;;  %v613_v62 = vadd.f32 %v3609_v41, %v581_v22  ;;  %v1088_v35 = vmul.f32 %v912_v39, %v2521_v32  ;;  %v548_v12 = vpop.permute.xlu0 %547  ;;  %v1280_v5 = vsub.f32 %v912_v39, %v2868_v1  ;;  %3612 = vst [vmem:[#allocation9_spill] sm:$0xff] %v3106_v29  ;;  %v3614_v56 = vld [vmem:[#allocation24_spill] sm:$0xff]  ;;  %v3615_v22 = vld [vmem:[#allocation26_spill] sm:$0xff]  ;;  %v3114_v37 = vpop.eup %1943 }
 0x125   :  { %v1358_v31 = vadd.f32 %v1342_v2, %v1310_v58  ;;  %v1328_v11 = vsub.f32 1.0, %v912_v39  ;;  %v582_v8 = vmul.f32 %v3611_v40, %v548_v12  ;;  %v864_v36 = vpop.permute.xlu1 %863  ;;  %v3616_v44 = vsel %vm2712_vm12, %v3614_v56, %v3615_v22  ;;  %3617 = vst [vmem:[#allocation15_spill] sm:$0xff] %v3114_v37  ;;  %v3119_v29 = vpop.eup %1945 }
 0x126   :  { %v1404_v50 = vmul.f32 %v1388_v10, %v1260_v46  ;;  %v1262_v41 = vadd.f32 %v3616_v44, %v1102_v6  ;;  %v1312_v49 = vmul.f32 0.25, %v912_v39  ;;  %vm898_vm8 = vcmp.eq.s32.totalorder %v3596_v26, %v864_v36  ;;  %v3619_v10 = vld [vmem:[#allocation29_spill] sm:$0xff] }
 0x127   :  { %v1374_v58 = vmul.f32 %v1358_v31, %v1294_v45  ;;  %v3618_v1 = vmax.f32 %v2521_v32, 0.0  ;;  %v1344_v12 = vmul.f32 0.75, %v1328_v11  ;;  %v914_v40 = vsel %vm898_vm8, 1.0, %v3598_v4  ;;  %v1422_v32 = vld [vmem:[#allocation3 + $0x10] sm:$0xff]  ;;  %v3621_v11 = vld [vmem:[#allocation28_spill] sm:$0xff] }
 0x128   :  { %v1484_v46 = vadd.f32 %v1420_v33, %v1404_v50  ;;  %v614_v30 = vadd.f32 %v3619_v10, %v582_v8  ;;  %v1090_v56 = vmul.f32 %v914_v40, %v2535_v9  ;;  %v1282_v6 = vsub.f32 %v914_v40, %v2894_v53  ;;  %v550_v39 = vpop.permute.xlu0 %549 }
 0x129   :  { %v1104_v2 = vsub.f32 %v3618_v1, %v1088_v35  ;;  %v1390_v36 = vmul.f32 %v1374_v58, %v1294_v45  ;;  %v1296_v22 = vand.u32 2147483647, %v1280_v5  ;;  %v1360_v44 = vadd.f32 %v1344_v12, %v1312_v49  ;;  %v870_v37 = vpop.permute.xlu1 %869 }
 0x12a   :  { %v1330_v31 = vsub.f32 1.0, %v914_v40  ;;  %vm711_vm12 = vcmp.eq.s32.totalorder %v2980_v61, 1  ;;  %1500 = vst.msk [vmem:[#allocation3] sm:$0xff] %vm115_vm1, %v1484_v46  ;;  %v3620_v50 = vmax.f32 %v2535_v9, 0.0  ;;  %v1314_v33 = vmul.f32 0.25, %v914_v40 }
 0x12b   :  { %v725_v53 = vsel %vm709_vm15, %v613_v62, 0.0  ;;  %v583_v45 = vmul.f32 %v3621_v11, %v550_v39  ;;  %v1406_v5 = vmul.f32 %v1390_v36, %v1262_v41  ;;  %v1376_v49 = vmul.f32 %v1360_v44, %v1296_v22  ;;  %v1426_v11 = vld [vmem:[#allocation3 + $0x30] sm:$0xff] }
 0x12c   :  { %v1106_v35 = vsub.f32 %v3620_v50, %v1090_v56  ;;  %v1346_v8 = vmul.f32 0.75, %v1330_v31  ;;  %769 = vrot.lane.b32.xlu1 %v725_v53, %s1992_s26  ;;  %vm900_vm11 = vcmp.eq.s32.totalorder %v3596_v26, %v870_v37  ;;  %v3622_v58 = vsel %vm2798_vm2, %v2778_v43, %v2839_v34  ;;  %v552_v62 = vpop.permute.xlu0 %551 }
 0x12d   :  { %v1264_v9 = vadd.f32 %v3622_v58, %v1104_v2  ;;  %v1298_v1 = vand.u32 2147483647, %v1282_v6  ;;  %v916_v12 = vsel %vm900_vm11, 1.0, %v3598_v4  ;;  %v726_v52 = vsel %vm710_vm4, %v614_v30, 0.0  ;;  %v876_v7 = vpop.permute.xlu1 %875  ;;  %v1424_v2 = vld [vmem:[#allocation3 + $0x20] sm:$0xff]  ;;  %v3627_v6 = vld [vmem:[#allocation30_spill] sm:$0xff] }
 0x12e   :  { %vm1029_vm15 = vcmp.ge.f32.partialorder %v3589_v51, 0.0  ;;  %v1486_v41 = vadd.f32 %v1422_v32, %v1406_v5  ;;  %v1392_v40 = vmul.f32 %v1376_v49, %v1296_v22  ;;  %v1362_v46 = vadd.f32 %v1346_v8, %v1314_v33  ;;  %771 = vrot.lane.b32.xlu0 %v726_v52, %s1992_s26  ;;  %v3628_v22 = vld [vmem:[#allocation31_spill] sm:$0xff] }
 0x12f   :  { %v1092_v37 = vmul.f32 %v916_v12, %v2544_v47  ;;  %v3623_v43 = vand.u32 2147483647, %v2886_v63  ;;  %v1266_v10 = vadd.f32 %v3626_v24, %v1106_v35  ;;  %v1284_v30 = vsub.f32 %v916_v12, %v2920_v48 }
 0x130   :  { %v1332_v56 = vsub.f32 1.0, %v916_v12  ;;  %v584_v39 = vmul.f32 %v3627_v6, %v552_v62  ;;  %1502 = vst.msk [vmem:[#allocation3 + $0x10] sm:$0xff] %vm115_vm1, %v1486_v41  ;;  %v1408_v36 = vmul.f32 %v1392_v40, %v1264_v9  ;;  %v1378_v63 = vmul.f32 %v1362_v46, %v1298_v1 }
 0x131   :  { %vm3147_vm2 = vcmp.lt.f32.partialorder %v3623_v43, 0.0004427343  ;;  %v615_v44 = vadd.f32 %v3628_v22, %v583_v45  ;;  %vm902_vm10 = vcmp.eq.s32.totalorder %v3596_v26, %v876_v7  ;;  %v1316_v31 = vmul.f32 0.25, %v916_v12  ;;  %v3642_v22 = vld [vmem:[#allocation32_spill] sm:$0xff] }
 0x132   :  { %v1348_v32 = vmul.f32 0.75, %v1332_v56  ;;  %v616_v50 = vadd.f32 %v3629_v19, %v584_v39  ;;  %v918_v14 = vsel %vm902_vm10, 1.0, %v3598_v4  ;;  %vm1031_vm5 = vcmp.ge.f32.partialorder %v2720_v3, 0.0 }
 0x133   :  { %v1488_v23 = vadd.f32 %v1424_v2, %v1408_v36  ;;  %v1394_v48 = vmul.f32 %v1378_v63, %v1298_v1  ;;  %v3630_v35 = vmax.f32 %v2544_v47, 0.0  ;;  %v1300_v53 = vand.u32 2147483647, %v1284_v30  ;;  %v1428_v36 = vld [vmem:[#allocation3 + $0x40] sm:$0xff] }
 0x134   :  { %v1364_v5 = vadd.f32 %v1348_v32, %v1316_v31  ;;  %v1094_v45 = vmul.f32 %v918_v14, %v2552_v59  ;;  %v1286_v49 = vsub.f32 %v918_v14, %v2936_v16  ;;  %v1334_v8 = vsub.f32 1.0, %v918_v14 }
 0x135   :  { %v1108_v33 = vsub.f32 %v3630_v35, %v1092_v37  ;;  %v3631_v58 = vand.u32 2147483647, %v2927_v13  ;;  %1504 = vst.msk [vmem:[#allocation3 + $0x20] sm:$0xff] %vm115_vm1, %v1488_v23  ;;  %v1410_v1 = vmul.f32 %v1394_v48, %v1266_v10  ;;  %v727_v47 = vsel %vm711_vm12, %v615_v44, 0.0  ;;  %v3636_v37 = vld [vmem:[#allocation38_spill] sm:$0xff]  ;;  %v3646_v35 = vld [vmem:[#allocation36_spill] sm:$0xff] }
 0x136   :  { %v728_v12 = vsel %vm712_vm6, %v616_v50, 0.0  ;;  %v3180_v52 = vmul.f32 0.6931472, %v3051_v25  ;;  %v1380_v16 = vmul.f32 %v1364_v5, %v1300_v53  ;;  %v1318_v62 = vmul.f32 0.25, %v918_v14  ;;  %773 = vrot.lane.b32.xlu1 %v727_v47, %s1992_s26 }
 0x137   :  { %vm3170_vm4 = vcmp.lt.f32.partialorder %v3631_v58, 0.0004427343  ;;  %v1350_v41 = vmul.f32 0.75, %v1334_v8  ;;  %775 = vrot.lane.b32.xlu0 %v728_v12, %s1992_s26  ;;  %vm1032_vm8 = vcmp.ge.f32.partialorder %v2758_v27, 0.0  ;;  %v3634_v40 = vand.u32 2147483647, %v3069_v0 }
 0x138   :  { %v1490_v61 = vadd.f32 %v1426_v11, %v1410_v1  ;;  %v3637_v7 = vsel %vm2844_vm9, %v3635_v21, %v3636_v37  ;;  %v3638_v43 = vand.u32 2147483647, %v2963_v57  ;;  %v1237_v24 = vadd.f32 1.0, %v3064_v20  ;;  %v3649_v58 = vld [vmem:[#allocation33_spill] sm:$0xff]  ;;  %v1962_v12 = vld [vmem:[%s3486_s1 + $0x18] sm:$0xff] }
 0x139   :  { %v955_v46 = vsub.f32 0.0, %v3634_v40  ;;  %v1268_v25 = vadd.f32 %v3637_v7, %v1108_v33  ;;  %v1239_v10 = vand.u32 2147483647, %v2969_v55  ;;  %v1396_v30 = vmul.f32 %v1380_v16, %v1300_v53  ;;  %v855_v50 = vpop.permute.xlu0 %854  ;;  %v3647_v33 = vld [vmem:[#allocation39_spill] sm:$0xff] }
 0x13a   :  { %vm3194_vm12 = vcmp.lt.f32.partialorder %v3638_v43, 0.0004427343  ;;  %v3641_v56 = vmax.f32 %v2552_v59, 0.0  ;;  %v1302_v39 = vand.u32 2147483647, %v1286_v49  ;;  %v1366_v17 = vadd.f32 %v1350_v41, %v1318_v62  ;;  %1506 = vst.msk [vmem:[#allocation3 + $0x30] sm:$0xff] %vm115_vm1, %v1490_v61 }
 0x13b   :  { %v3207_v63 = vsel %vm1029_vm15, %v3036_v60, %v3056_v54  ;;  %v1047_v20 = vmul.f32 %v3071_v28, %v2927_v13  ;;  %vm1033_vm9 = vcmp.ge.f32.partialorder %v3642_v22, 0.0  ;;  %v1245_v44 = vmul.f32 -0.5, %v2990_v18  ;;  %v3650_v62 = vld [vmem:[#allocation8_spill] sm:$0xff]  ;;  %v3652_v61 = vld [vmem:[#allocation17_spill] sm:$0xff] }
 0x13c   :  { %v1110_v6 = vsub.f32 %v3641_v56, %v1094_v45  ;;  %v1412_v59 = vmul.f32 %v1396_v30, %v1268_v25  ;;  %v1382_v31 = vmul.f32 %v1366_v17, %v1302_v39  ;;  %v1205_v32 = vsel %vm3147_vm2, %v3021_v42, %v3180_v52  ;;  %v3653_v25 = vld [vmem:[#allocation18_spill] sm:$0xff] }
 0x13d   :  { %v986_v19 = vmul.f32 1.442695, %v955_v46  ;;  %v3218_v14 = vmul.f32 0.6931472, %v3080_v38  ;;  %v1081_v60 = vmax.f32 %v3642_v22, 0.0  ;;  %v3222_v13 = vmul.f32 %v2969_v55, %v1237_v24  ;;  %v1430_v38 = vld [vmem:[#allocation3 + $0x50] sm:$0xff] }
 0x13e   :  { %vm3224_vm6 = vcmp.lt.f32.partialorder %v1239_v10, 0.0004427343  ;;  %v1492_v23 = vadd.f32 %v1428_v36, %v1412_v59  ;;  %v3648_v53 = vsel %vm2860_vm13, %v3646_v35, %v3647_v33  ;;  %v1398_v5 = vmul.f32 %v1382_v31, %v1302_v39  ;;  %v3654_v39 = vld [vmem:[#allocation10_spill] sm:$0xff]  ;;  %v3657_v31 = vld [vmem:[#allocation9_spill] sm:$0xff] }
 0x13f   :  { %v1270_v11 = vadd.f32 %v3648_v53, %v1110_v6  ;;  %vm895_vm11 = vcmp.eq.s32.totalorder %v3596_v26, %v855_v50  ;;  %v3238_v49 = vsel %vm1031_vm5, %v3071_v28, %v1047_v20  ;;  %v1048_v8 = vmul.f32 %v3089_v15, %v2963_v57  ;;  %v3651_v28 = vld [vmem:[#allocation45_spill] sm:$0xff]  ;;  %v861_v57 = vpop.permute.xlu0 %860  ;;  %v3659_v53 = vld [vmem:[#allocation11_spill] sm:$0xff] }
 0x140   :  { %v911_v45 = vsel %vm895_vm11, 1.0, %v3598_v4  ;;  %vm1034_vm15 = vcmp.ge.f32.partialorder %v3649_v58, 0.0  ;;  %v3243_v1 = vadd.f32 1.0, %v1245_v44  ;;  %1508 = vst.msk [vmem:[#allocation3 + $0x40] sm:$0xff] %vm115_vm1, %v1492_v23  ;;  %v3250_v41 = vmul.f32 0.6931472, %v3650_v62 }
 0x141   :  { %v1414_v47 = vmul.f32 %v1398_v5, %v1270_v11  ;;  %v1087_v16 = vmul.f32 %v1962_v12, %v911_v45  ;;  %1947 = vpow2.f32 %v986_v19  ;;  %v1279_v40 = vsub.f32 %v911_v45, %v3651_v28  ;;  %v3656_v44 = vld [vmem:[#allocation14_spill] sm:$0xff]  ;;  %v3658_v23 = vld [vmem:[#allocation16_spill] sm:$0xff] }
 0x142   :  { %v1327_v46 = vsub.f32 1.0, %v911_v45  ;;  %v1223_v21 = vsel %vm3170_vm4, %v3652_v61, %v3218_v14  ;;  %v1082_v37 = vmax.f32 %v3649_v58, 0.0  ;;  %vm897_vm13 = vcmp.eq.s32.totalorder %v3596_v26, %v861_v57  ;;  %v1641_v58 = vld [vmem:[#allocation3 + $0x8] sm:$0xff] }
 0x143   :  { %v1494_v7 = vadd.f32 %v1430_v38, %v1414_v47  ;;  %v1049_v43 = vmul.f32 %v3653_v25, %v2969_v55  ;;  %v1248_v24 = vand.u32 2147483647, %v2990_v18  ;;  %v1311_v10 = vmul.f32 0.25, %v911_v45  ;;  %v1963_v55 = vld [vmem:[%s3486_s1 + $0x28] sm:$0xff]  ;;  %v867_v33 = vpop.permute.xlu0 %866  ;;  %v3661_v45 = vld [vmem:[#allocation15_spill] sm:$0xff] }
 0x144   :  { %v1343_v30 = vmul.f32 0.75, %v1327_v46  ;;  %v913_v56 = vsel %vm897_vm13, 1.0, %v3598_v4  ;;  %v3266_v6 = vsel %vm1032_vm8, %v3089_v15, %v1048_v8  ;;  %v3655_v17 = vmax.f32 %v3654_v39, 0.0  ;;  %v3664_v46 = vld [vmem:[#allocation43_spill] sm:$0xff] }
 0x145   :  { %1510 = vst.msk [vmem:[#allocation3 + $0x50] sm:$0xff] %vm115_vm1, %v1494_v7  ;;  %v1089_v20 = vmul.f32 %v1963_v55, %v913_v56  ;;  %v1232_v59 = vsel %vm3194_vm12, %v3656_v44, %v3250_v41  ;;  %v3279_v19 = vmul.f32 0.6931472, %v3657_v31  ;;  %v1295_v15 = vand.u32 2147483647, %v1279_v40  ;;  %v3663_v40 = vld [vmem:[#allocation41_spill] sm:$0xff] }
 0x146   :  { %v1103_v36 = vsub.f32 %v3655_v17, %v1087_v16  ;;  %v1359_v50 = vadd.f32 %v1343_v30, %v1311_v10  ;;  %v1281_v48 = vsub.f32 %v913_v56, %v3658_v23  ;;  %v1329_v35 = vsub.f32 1.0, %v913_v56  ;;  %v1964_v10 = vld [vmem:[%s3486_s1 + $0x38] sm:$0xff]  ;;  %v1966_v41 = vld [vmem:[%s3486_s1 + $0x70] sm:$0xff] }
 0x147   :  { %v3660_v11 = vmax.f32 %v3659_v53, 0.0  ;;  %vm899_vm10 = vcmp.eq.s32.totalorder %v3596_v26, %v867_v33  ;;  %v3288_v38 = vsel %vm1033_vm9, %v3653_v25, %v1049_v43  ;;  %v1050_v8 = vmul.f32 %v3661_v45, %v2990_v18  ;;  %v3666_v43 = vld [vmem:[#allocation13_spill] sm:$0xff]  ;;  %v873_v31 = vpop.permute.xlu0 %872 }
 0x148   :  { %v1375_v47 = vmul.f32 %v1359_v50, %v1295_v15  ;;  %v1313_v12 = vmul.f32 0.25, %v913_v56  ;;  %v1345_v16 = vmul.f32 0.75, %v1329_v35  ;;  %v915_v62 = vsel %vm899_vm10, 1.0, %v3598_v4  ;;  %v1423_v50 = vld [vmem:[#allocation3 + $0x18] sm:$0xff]  ;;  %v3669_v35 = vld [vmem:[#allocation47_spill] sm:$0xff] }
 0x149   :  { %v1105_v5 = vsub.f32 %v3660_v11, %v1089_v20  ;;  %v3665_v57 = vsel %vm2912_vm3, %v3663_v40, %v3664_v46  ;;  %v1091_v25 = vmul.f32 %v1964_v10, %v915_v62  ;;  %v1283_v30 = vsub.f32 %v915_v62, %v3666_v43  ;;  %v3671_v40 = vld [vmem:[#allocation12_spill] sm:$0xff] }
 0x14a   :  { %v1263_v7 = vadd.f32 %v3665_v57, %v1103_v36  ;;  %v1241_v56 = vsel %vm3224_vm6, %v3222_v13, %v3279_v19  ;;  %v1391_v39 = vmul.f32 %v1375_v47, %v1295_v15  ;;  %v1297_v17 = vand.u32 2147483647, %v1281_v48  ;;  %v3668_v36 = vld [vmem:[#allocation42_spill] sm:$0xff] }
 0x14b   :  { %v1361_v55 = vadd.f32 %v1345_v16, %v1313_v12  ;;  %v1331_v20 = vsub.f32 1.0, %v915_v62  ;;  %v3670_v33 = vsel %vm2956_vm7, %v3668_v36, %v3669_v35  ;;  %v1315_v11 = vmul.f32 0.25, %v915_v62  ;;  %v1696_v16 = vld [vmem:[#allocation4] sm:$0xff] }
 0x14c   :  { %v1265_v53 = vadd.f32 %v3670_v33, %v1105_v5  ;;  %vm901_vm3 = vcmp.eq.s32.totalorder %v3596_v26, %v873_v31  ;;  %v3315_v28 = vsel %vm1034_vm15, %v3661_v45, %v1050_v8  ;;  %v1407_v15 = vmul.f32 %v1391_v39, %v1263_v7  ;;  %v879_v7 = vpop.permute.xlu0 %878  ;;  %v1425_v39 = vld [vmem:[#allocation3 + $0x28] sm:$0xff] }
 0x14d   :  { %v1377_v48 = vmul.f32 %v1361_v55, %v1297_v17  ;;  %v1347_v47 = vmul.f32 0.75, %v1331_v20  ;;  %v917_v12 = vsel %vm901_vm3, 1.0, %v3598_v4  ;;  %v3672_v46 = vmax.f32 %v3671_v40, 0.0 }
 0x14e   :  { %v1299_v10 = vand.u32 2147483647, %v1283_v30  ;;  %v1093_v5 = vmul.f32 %v917_v12, %v3589_v51  ;;  %v1285_v62 = vsub.f32 %v917_v12, %v3207_v63  ;;  %v3322_v43 = vpop.eup %1947  ;;  %v1487_v31 = vadd.f32 %v1423_v50, %v1407_v15  ;;  %v3676_v15 = vld [vmem:[#allocation19_spill] sm:$0xff] }
 0x14f   :  { %v1107_v57 = vsub.f32 %v3672_v46, %v1091_v25  ;;  %v1393_v23 = vmul.f32 %v1377_v48, %v1297_v17  ;;  %v1363_v45 = vadd.f32 %v1347_v47, %v1315_v11  ;;  %v1333_v8 = vsub.f32 1.0, %v917_v12  ;;  %v1697_v17 = vld [vmem:[#allocation4 + $0x8] sm:$0xff]  ;;  %v3675_v11 = vld [vmem:[#allocation46_spill] sm:$0xff] }
 0x150   :  { %v3673_v55 = vmax.f32 %v3589_v51, 0.0  ;;  %v1317_v36 = vmul.f32 0.25, %v917_v12  ;;  %vm903_vm7 = vcmp.eq.s32.totalorder %v3596_v26, %v879_v7  ;;  %v1712_v25 = vsel %vm148_vm0, %v1696_v16, 0.0  ;;  %1503 = vst.msk [vmem:[#allocation3 + $0x18] sm:$0xff] %vm115_vm1, %v1487_v31  ;;  %v882_v31 = vpop.permute.xlu0 %881 }
 0x151   :  { %v1409_v30 = vmul.f32 %v1393_v23, %v1265_v53  ;;  %v1379_v63 = vmul.f32 %v1363_v45, %v1299_v10  ;;  %v1349_v35 = vmul.f32 0.75, %v1333_v8  ;;  %v919_v50 = vsel %vm903_vm7, 1.0, %v3598_v4  ;;  %v1427_v23 = vld [vmem:[#allocation3 + $0x38] sm:$0xff] }
 0x152   :  { %v1109_v20 = vsub.f32 %v3673_v55, %v1093_v5  ;;  %v3677_v48 = vsel %vm2993_vm14, %v3675_v11, %v3676_v15  ;;  %v1301_v47 = vand.u32 2147483647, %v1285_v62  ;;  %v1095_v12 = vmul.f32 %v919_v50, %v2720_v3 }
 0x153   :  { %v1267_v51 = vadd.f32 %v3677_v48, %v1107_v57  ;;  %v1287_v40 = vsub.f32 %v919_v50, %v3238_v49  ;;  %v1489_v16 = vadd.f32 %v1425_v39, %v1409_v30  ;;  %v1395_v46 = vmul.f32 %v1379_v63, %v1299_v10 }
 0x154   :  { %v1365_v5 = vadd.f32 %v1349_v35, %v1317_v36  ;;  %v1335_v53 = vsub.f32 1.0, %v919_v50  ;;  %v1269_v45 = vadd.f32 %v1205_v32, %v1109_v20  ;;  %v1319_v8 = vmul.f32 0.25, %v919_v50  ;;  %v885_v63 = vpop.permute.xlu0 %884  ;;  %v1429_v35 = vld [vmem:[#allocation3 + $0x48] sm:$0xff] }
 0x155   :  { %vm904_vm14 = vcmp.eq.s32.totalorder %v3596_v26, %v882_v31  ;;  %v1713_v57 = vsel %vm148_vm0, %v1697_v17, 0.0  ;;  %1505 = vst.msk [vmem:[#allocation3 + $0x28] sm:$0xff] %vm115_vm1, %v1489_v16  ;;  %v1411_v49 = vmul.f32 %v1395_v46, %v1267_v51  ;;  %v3678_v39 = vmax.f32 %v2720_v3, 0.0  ;;  %v1698_v51 = vld [vmem:[#allocation4 + $0x10] sm:$0xff] }
 0x156   :  { %v1381_v62 = vmul.f32 %v1365_v5, %v1301_v47  ;;  %v1351_v10 = vmul.f32 0.75, %v1335_v53  ;;  %v920_v7 = vsel %vm904_vm14, 1.0, %v3598_v4  ;;  %v1303_v34 = vand.u32 2147483647, %v1287_v40 }
 0x157   :  { %v1111_v55 = vsub.f32 %v3678_v39, %v1095_v12  ;;  %v1096_v36 = vmul.f32 %v920_v7, %v2758_v27  ;;  %v1288_v42 = vsub.f32 %v920_v7, %v3266_v6  ;;  %v1491_v52 = vadd.f32 %v1427_v23, %v1411_v49  ;;  %v1965_v12 = vld [vmem:[%s3486_s1 + $0x68] sm:$0xff]  ;;  %v1431_v23 = vld [vmem:[#allocation3 + $0x58] sm:$0xff]  ;;  %v1432_v39 = vld [vmem:[#allocation3 + $0x60] sm:$0xff] }
 0x158   :  { %v1397_v32 = vmul.f32 %v1381_v62, %v1301_v47  ;;  %v1367_v20 = vadd.f32 %v1351_v10, %v1319_v8  ;;  %v1336_v30 = vsub.f32 1.0, %v920_v7  ;;  %v3679_v50 = vmax.f32 %v2758_v27, 0.0  ;;  %v888_v31 = vpop.permute.xlu0 %887 }
 0x159   :  { %v1320_v33 = vmul.f32 0.25, %v920_v7  ;;  %vm905_vm2 = vcmp.eq.s32.totalorder %v3596_v26, %v885_v63  ;;  %v1714_v11 = vadd.f32 %v1713_v57, %v1712_v25  ;;  %1507 = vst.msk [vmem:[#allocation3 + $0x38] sm:$0xff] %vm115_vm1, %v1491_v52  ;;  %v1271_v47 = vadd.f32 %v1223_v21, %v1111_v55  ;;  %v1699_v52 = vld [vmem:[#allocation4 + $0x18] sm:$0xff] }
 0x15a   :  { %v1112_v17 = vsub.f32 %v3679_v50, %v1096_v36  ;;  %v1413_v3 = vmul.f32 %v1397_v32, %v1269_v45  ;;  %v1383_v15 = vmul.f32 %v1367_v20, %v1303_v34  ;;  %v1352_v48 = vmul.f32 0.75, %v1336_v30  ;;  %v1433_v50 = vld [vmem:[#allocation3 + $0x68] sm:$0xff] }
 0x15b   :  { %v921_v6 = vsel %vm905_vm2, 1.0, %v3598_v4  ;;  %v1304_v27 = vand.u32 2147483647, %v1288_v42  ;;  %vm906_vm5 = vcmp.eq.s32.totalorder %v3596_v26, %v888_v31  ;;  %v1715_v61 = vsel %vm148_vm0, %v1698_v51, 0.0  ;;  %v1434_v51 = vld [vmem:[#allocation3 + $0x70] sm:$0xff] }
 0x15c   :  { %v1097_v25 = vmul.f32 %v1965_v12, %v921_v6  ;;  %v1289_v40 = vsub.f32 %v921_v6, %v3288_v38  ;;  %v1493_v16 = vadd.f32 %v1429_v35, %v1413_v3  ;;  %v1399_v46 = vmul.f32 %v1383_v15, %v1303_v34  ;;  %v1640_v35 = vld [vmem:[#allocation3] sm:$0xff] }
 0x15d   :  { %v1368_v5 = vadd.f32 %v1352_v48, %v1320_v33  ;;  %v1337_v53 = vsub.f32 1.0, %v921_v6  ;;  %v1272_v9 = vadd.f32 %v1232_v59, %v1112_v17  ;;  %v1321_v14 = vmul.f32 0.25, %v921_v6  ;;  %v1643_v48 = vld [vmem:[#allocation3 + $0x18] sm:$0xff] }
 0x15e   :  { %1509 = vst.msk [vmem:[#allocation3 + $0x48] sm:$0xff] %vm115_vm1, %v1493_v16  ;;  %v1415_v21 = vmul.f32 %v1399_v46, %v1271_v47  ;;  %v922_v8 = vsel %vm906_vm5, 1.0, %v3598_v4  ;;  %v1113_v57 = vsub.f32 %v1081_v60, %v1097_v25  ;;  %v1305_v2 = vand.u32 2147483647, %v1289_v40  ;;  %v1701_v16 = vld [vmem:[#allocation4 + $0x28] sm:$0xff] }
 0x15f   :  { %v1384_v38 = vmul.f32 %v1368_v5, %v1304_v27  ;;  %v1353_v45 = vmul.f32 0.75, %v1337_v53  ;;  %v1098_v44 = vmul.f32 %v1966_v41, %v922_v8  ;;  %v1290_v59 = vsub.f32 %v922_v8, %v3315_v28 }
 0x160   :  { %v1495_v49 = vadd.f32 %v1431_v23, %v1415_v21  ;;  %v1338_v7 = vsub.f32 1.0, %v922_v8  ;;  %v1244_v55 = vmul.f32 0.6931472, %v3119_v29  ;;  %v1247_v34 = vmul.f32 %v2990_v18, %v3243_v1  ;;  %v617_v23 = vld [vmem:[#allocation2] sm:$0xff]  ;;  %v1702_v21 = vld [vmem:[#allocation4 + $0x30] sm:$0xff] }
 0x161   :  { %v1400_v62 = vmul.f32 %v1384_v38, %v1304_v27  ;;  %v1369_v10 = vadd.f32 %v1353_v45, %v1321_v14  ;;  %vm3384_vm4 = vcmp.lt.f32.partialorder %v1248_v24, 0.0004427343  ;;  %v1322_v36 = vmul.f32 0.25, %v922_v8  ;;  %v1644_v14 = vld [vmem:[#allocation3 + $0x20] sm:$0xff]  ;;  %v1645_v8 = vld [vmem:[#allocation3 + $0x28] sm:$0xff] }
 0x162   :  { %1511 = vst.msk [vmem:[#allocation3 + $0x58] sm:$0xff] %vm115_vm1, %v1495_v49  ;;  %v1354_v42 = vmul.f32 0.75, %v1338_v7  ;;  %v1273_v29 = vadd.f32 %v1241_v56, %v1113_v57  ;;  %v1114_v18 = vsub.f32 %v1082_v37, %v1098_v44  ;;  %v1003_v1 = vadd.f32 1.0, %v3322_v43  ;;  %v1642_v37 = vld [vmem:[#allocation3 + $0x10] sm:$0xff]  ;;  %v1700_v56 = vld [vmem:[#allocation4 + $0x20] sm:$0xff]  ;;  %v1703_v49 = vld [vmem:[#allocation4 + $0x38] sm:$0xff] }
 0x163   :  { %v1416_v60 = vmul.f32 %v1400_v62, %v1272_v9  ;;  %v1385_v28 = vmul.f32 %v1369_v10, %v1305_v2  ;;  %v1716_v24 = vadd.f32 %v1715_v61, %v1714_v11  ;;  %v1306_v30 = vand.u32 2147483647, %v1290_v59 }
 0x164   :  { %v1370_v63 = vadd.f32 %v1354_v42, %v1322_v36  ;;  %v1250_v17 = vsel %vm3384_vm4, %v1247_v34, %v1244_v55  ;;  %v1717_v54 = vsel %vm148_vm0, %v1699_v52, 0.0  ;;  %1949 = vrcp.f32 %v1003_v1  ;;  %v619_v34 = vld [vmem:[#allocation2 + $0x10] sm:$0xff]  ;;  %v1704_v36 = vld [vmem:[#allocation4 + $0x40] sm:$0xff] }
 0x165   :  { %v1496_v32 = vadd.f32 %v1432_v39, %v1416_v60  ;;  %v1401_v20 = vmul.f32 %v1385_v28, %v1305_v2  ;;  %v1656_v33 = vsel %vm115_vm1, %v1640_v35, 0.0  ;;  %v1274_v3 = vadd.f32 %v1250_v17, %v1114_v18  ;;  %v618_v2 = vld [vmem:[#allocation2 + $0x8] sm:$0xff]  ;;  %v1646_v60 = vld [vmem:[#allocation3 + $0x30] sm:$0xff] }
 0x166   :  { %v1386_v19 = vmul.f32 %v1370_v63, %v1306_v30  ;;  %v1718_v6 = vadd.f32 %v1717_v54, %v1716_v24  ;;  %v1657_v47 = vsel %vm115_vm1, %v1641_v58, 0.0  ;;  %v1659_v27 = vsel %vm115_vm1, %v1642_v37, 0.0  ;;  %v1705_v35 = vld [vmem:[#allocation4 + $0x48] sm:$0xff] }
 0x167   :  { %1512 = vst.msk [vmem:[#allocation3 + $0x60] sm:$0xff] %vm115_vm1, %v1496_v32  ;;  %v1417_v13 = vmul.f32 %v1401_v20, %v1273_v29  ;;  %v1719_v12 = vsel %vm148_vm0, %v1700_v56, 0.0  ;;  %v1658_v40 = vadd.f32 %v1657_v47, %v1656_v33  ;;  %v1661_v46 = vsel %vm115_vm1, %v1643_v48, 0.0  ;;  %v620_v32 = vld [vmem:[#allocation2 + $0x18] sm:$0xff]  ;;  %v1706_v47 = vld [vmem:[#allocation4 + $0x50] sm:$0xff] }
 0x168   :  { %v1402_v15 = vmul.f32 %v1386_v19, %v1306_v30  ;;  %v1720_v31 = vadd.f32 %v1719_v12, %v1718_v6  ;;  %v1721_v9 = vsel %vm148_vm0, %v1701_v16, 0.0  ;;  %v746_v38 = vpop.permute.xlu0 %745  ;;  %1951 = vlog2.f32 %v1003_v1  ;;  %v1647_v1 = vld [vmem:[#allocation3 + $0x38] sm:$0xff]  ;;  %v1648_v6 = vld [vmem:[#allocation3 + $0x40] sm:$0xff] }
 0x169   :  { %v1497_v11 = vadd.f32 %v1433_v50, %v1417_v13  ;;  %v1660_v53 = vadd.f32 %v1659_v27, %v1658_v40  ;;  %v793_v45 = vadd.f32 %v746_v38, %v617_v23  ;;  %v1663_v41 = vsel %vm115_vm1, %v1644_v14, 0.0  ;;  %v622_v14 = vld [vmem:[#allocation2 + $0x28] sm:$0xff] }
 0x16a   :  { %v1418_v25 = vmul.f32 %v1402_v15, %v1274_v3  ;;  %v1722_v57 = vadd.f32 %v1721_v9, %v1720_v31  ;;  %v1723_v44 = vsel %vm148_vm0, %v1702_v21, 0.0  ;;  %v1665_v10 = vsel %vm115_vm1, %v1645_v8, 0.0  ;;  %v1649_v31 = vld [vmem:[#allocation3 + $0x48] sm:$0xff] }
 0x16b   :  { %1513 = vst.msk [vmem:[#allocation3 + $0x68] sm:$0xff] %vm115_vm1, %v1497_v11  ;;  %v1662_v61 = vadd.f32 %v1661_v46, %v1660_v53  ;;  %810 = vst.msk [vmem:[#allocation2] sm:$0xff] %vm115_vm1, %v793_v45  ;;  %v1725_v22 = vsel %vm148_vm0, %v1703_v49, 0.0  ;;  %v1254_v18 = vmul.f32 -0.5, %v3322_v43  ;;  %vm1035_vm8 = vcmp.ge.f32.partialorder %v3069_v0, 0.0  ;;  %v621_v11 = vld [vmem:[#allocation2 + $0x20] sm:$0xff] }
 0x16c   :  { %v1498_v5 = vadd.f32 %v1434_v51, %v1418_v25  ;;  %v748_v62 = vpop.permute.xlu1 %747  ;;  %v1724_v55 = vadd.f32 %v1723_v44, %v1722_v57  ;;  %v1667_v20 = vsel %vm115_vm1, %v1646_v60, 0.0  ;;  %v1727_v30 = vsel %vm148_vm0, %v1704_v36, 0.0 }
 0x16d   :  { %v1664_v59 = vadd.f32 %v1663_v41, %v1662_v61  ;;  %v794_v39 = vadd.f32 %v748_v62, %v618_v2  ;;  %v1257_v17 = vand.u32 2147483647, %v3322_v43  ;;  %v1669_v54 = vsel %vm115_vm1, %v1647_v1, 0.0  ;;  %v623_v62 = vld [vmem:[#allocation2 + $0x30] sm:$0xff] }
 0x16e   :  { %1514 = vst.msk [vmem:[#allocation3 + $0x70] sm:$0xff] %vm115_vm1, %v1498_v5  ;;  %v1726_v24 = vadd.f32 %v1725_v22, %v1724_v55  ;;  %v1255_v58 = vadd.f32 1.0, %v1254_v18  ;;  %v1729_v3 = vsel %vm148_vm0, %v1705_v35, 0.0  ;;  %v1083_v15 = vmax.f32 %v3069_v0, 0.0  ;;  %v1708_v55 = vld [vmem:[#allocation4 + $0x60] sm:$0xff]  ;;  %v624_v18 = vld [vmem:[#allocation2 + $0x38] sm:$0xff] }
 0x16f   :  { %811 = vst.msk [vmem:[#allocation2 + $0x8] sm:$0xff] %vm115_vm1, %v794_v39  ;;  %v1666_v28 = vadd.f32 %v1665_v10, %v1664_v59  ;;  %vm3428_vm9 = vcmp.lt.f32.partialorder %v1257_v17, 0.0004427343  ;;  %v1671_v61 = vsel %vm115_vm1, %v1648_v6, 0.0  ;;  %v1731_v21 = vsel %vm148_vm0, %v1706_v47, 0.0  ;;  %v626_v47 = vld [vmem:[#allocation2 + $0x48] sm:$0xff] }
 0x170   :  { %v750_v42 = vpop.permute.xlu1 %749  ;;  %v1728_v56 = vadd.f32 %v1727_v30, %v1726_v24  ;;  %v1256_v5 = vmul.f32 %v3322_v43, %v1255_v58  ;;  %v1735_v24 = vsel %vm148_vm0, %v1708_v55, 0.0  ;;  %v1709_v30 = vld [vmem:[#allocation4 + $0x68] sm:$0xff]  ;;  %vm1759_vm6 = vcmp.eq.s32.totalorder %v3596_v26, 2 }
 0x171   :  { %v1950_v7 = vpop.eup %1949  ;;  %v795_v52 = vadd.f32 %v750_v42, %v619_v34  ;;  %v1668_v63 = vadd.f32 %v1667_v20, %v1666_v28  ;;  %v1435_v28 = vld [vmem:[#allocation3 + $0x78] sm:$0xff] }
 0x172   :  { %v1051_v29 = vmul.f32 %v1950_v7, %v3322_v43  ;;  %v1730_v23 = vadd.f32 %v1729_v3, %v1728_v56  ;;  %v1673_v43 = vsel %vm115_vm1, %v1649_v31, 0.0  ;;  %v1651_v42 = vld [vmem:[#allocation3 + $0x58] sm:$0xff] }
 0x173   :  { %812 = vst.msk [vmem:[#allocation2 + $0x10] sm:$0xff] %vm115_vm1, %v795_v52  ;;  %v1670_v51 = vadd.f32 %v1669_v54, %v1668_v63  ;;  %v1653_v54 = vld [vmem:[#allocation3 + $0x68] sm:$0xff] }
 0x174   :  { %v752_v50 = vpop.permute.xlu1 %751  ;;  %v1067_v19 = vsel %vm1035_vm8, %v1950_v7, %v1051_v29  ;;  %v1732_v59 = vadd.f32 %v1731_v21, %v1730_v23  ;;  %v1650_v7 = vld [vmem:[#allocation3 + $0x50] sm:$0xff] }
 0x175   :  { %v796_v13 = vadd.f32 %v752_v50, %v620_v32  ;;  %v891_v37 = vpop.permute.xlu0 %890  ;;  %v1952_v33 = vpop.eup %1951  ;;  %v1672_v38 = vadd.f32 %v1671_v61, %v1670_v51  ;;  %v1675_v1 = vsel %vm115_vm1, %v1650_v7, 0.0  ;;  %v1652_v32 = vld [vmem:[#allocation3 + $0x60] sm:$0xff]  ;;  %v1677_v50 = vsel %vm115_vm1, %v1651_v42, 0.0  ;;  %v1654_v56 = vld [vmem:[#allocation3 + $0x70] sm:$0xff]  ;;  %v630_v42 = vld [vmem:[#allocation2 + $0x68] sm:$0xff] }
 0x176   :  { %vm907_vm12 = vcmp.eq.s32.totalorder %v3596_v26, %v891_v37  ;;  %v1253_v46 = vmul.f32 0.6931472, %v1952_v33  ;;  %v1679_v58 = vsel %vm115_vm1, %v1652_v32, 0.0  ;;  %v1737_v37 = vsel %vm148_vm0, %v1709_v30, 0.0  ;;  %v627_v23 = vld [vmem:[#allocation2 + $0x50] sm:$0xff] }
 0x177   :  { %813 = vst.msk [vmem:[#allocation2 + $0x18] sm:$0xff] %vm115_vm1, %v796_v13  ;;  %v923_v48 = vsel %vm907_vm12, 1.0, %v3598_v4  ;;  %v1674_v39 = vadd.f32 %v1673_v43, %v1672_v38  ;;  %v1683_v27 = vsel %vm115_vm1, %v1654_v56, 0.0 }
 0x178   :  { %v1099_v12 = vmul.f32 %v923_v48, %v3069_v0  ;;  %v1291_v25 = vsub.f32 %v923_v48, %v1067_v19  ;;  %v1339_v40 = vsub.f32 1.0, %v923_v48  ;;  %v754_v16 = vpop.permute.xlu1 %753  ;;  %v1323_v9 = vmul.f32 0.25, %v923_v48  ;;  %v1707_v0 = vld [vmem:[#allocation4 + $0x58] sm:$0xff]  ;;  %v625_v19 = vld [vmem:[#allocation2 + $0x40] sm:$0xff] }
 0x179   :  { %v797_v53 = vadd.f32 %v754_v16, %v621_v11  ;;  %v1259_v41 = vsel %vm3428_vm9, %v1256_v5, %v1253_v46  ;;  %v1733_v10 = vsel %vm148_vm0, %v1707_v0, 0.0  ;;  %v1676_v20 = vadd.f32 %v1675_v1, %v1674_v39  ;;  %v1710_v11 = vld [vmem:[#allocation4 + $0x70] sm:$0xff]  ;;  %v628_v0 = vld [vmem:[#allocation2 + $0x58] sm:$0xff] }
 0x17a   :  { %v1355_v4 = vmul.f32 0.75, %v1339_v40  ;;  %v1115_v45 = vsub.f32 %v1083_v15, %v1099_v12  ;;  %v1307_v8 = vand.u32 2147483647, %v1291_v25  ;;  %v1734_v52 = vadd.f32 %v1733_v10, %v1732_v59  ;;  %v1711_v40 = vld [vmem:[#allocation4 + $0x78] sm:$0xff] }
 0x17b   :  { %814 = vst.msk [vmem:[#allocation2 + $0x20] sm:$0xff] %vm115_vm1, %v797_v53  ;;  %v1678_v33 = vadd.f32 %v1677_v50, %v1676_v20  ;;  %v1681_v15 = vsel %vm115_vm1, %v1653_v54, 0.0  ;;  %v1739_v12 = vsel %vm148_vm0, %v1710_v11, 0.0 }
 0x17c   :  { %v1371_v57 = vadd.f32 %v1355_v4, %v1323_v9  ;;  %v756_v2 = vpop.permute.xlu1 %755  ;;  %v1275_v34 = vadd.f32 %v1259_v41, %v1115_v45  ;;  %v1736_v13 = vadd.f32 %v1735_v24, %v1734_v52  ;;  %v1741_v4 = vsel %vm148_vm0, %v1711_v40, 0.0  ;;  %v1585_v45 = vld [vmem:[#allocation2 + $0x8] sm:$0xff] }
 0x17d   :  { %v798_v44 = vadd.f32 %v756_v2, %v622_v14  ;;  %v1680_v6 = vadd.f32 %v1679_v58, %v1678_v33  ;;  %v1586_v2 = vld [vmem:[#allocation2 + $0x10] sm:$0xff]  ;;  %v1601_v41 = vsel %vm115_vm1, %v1585_v45, 0.0  ;;  %vm1752_vm0 = vcmp.eq.s32.totalorder %v3596_v26, 0 }
 0x17e   :  { %v1387_v49 = vmul.f32 %v1371_v57, %v1307_v8  ;;  %v1738_v51 = vadd.f32 %v1737_v37, %v1736_v13  ;;  %v1584_v57 = vld [vmem:[#allocation2] sm:$0xff]  ;;  %v631_v13 = vld [vmem:[#allocation2 + $0x70] sm:$0xff] }
 0x17f   :  { %815 = vst.msk [vmem:[#allocation2 + $0x28] sm:$0xff] %vm115_vm1, %v798_v44  ;;  %v1682_v25 = vadd.f32 %v1681_v15, %v1680_v6  ;;  %v1587_v44 = vld [vmem:[#allocation2 + $0x18] sm:$0xff]  ;;  %v1600_v59 = vsel %vm115_vm1, %v1584_v57, 0.0 }
 0x180   :  { %v1403_v22 = vmul.f32 %v1387_v49, %v1307_v8  ;;  %v758_v60 = vpop.permute.xlu1 %757  ;;  %v1740_v31 = vadd.f32 %v1739_v12, %v1738_v51  ;;  %v1603_v49 = vsel %vm115_vm1, %v1586_v2, 0.0  ;;  %v1602_v10 = vadd.f32 %v1601_v41, %v1600_v59 }
 0x181   :  { %v799_v36 = vadd.f32 %v758_v60, %v623_v62  ;;  %v1684_v53 = vadd.f32 %v1683_v27, %v1682_v25  ;;  %v1605_v7 = vsel %vm115_vm1, %v1587_v44, 0.0 }
 0x182   :  { %v1419_v29 = vmul.f32 %v1403_v22, %v1275_v34  ;;  %v1742_v38 = vadd.f32 %v1741_v4, %v1740_v31  ;;  %v1588_v62 = vld [vmem:[#allocation2 + $0x20] sm:$0xff]  ;;  %v1604_v55 = vadd.f32 %v1603_v49, %v1602_v10 }
 0x183   :  { %816 = vst.msk [vmem:[#allocation2 + $0x30] sm:$0xff] %vm115_vm1, %v799_v36  ;;  %v629_v34 = vld [vmem:[#allocation2 + $0x60] sm:$0xff]  ;;  %v1607_v22 = vsel %vm115_vm1, %v1588_v62, 0.0 }
 0x184   :  { %v1499_v63 = vadd.f32 %v1435_v28, %v1419_v29  ;;  %v760_v35 = vpop.permute.xlu0 %759  ;;  %v1606_v28 = vadd.f32 %v1605_v7, %v1604_v55 }
 0x185   :  { %v800_v17 = vadd.f32 %v760_v35, %v624_v18 }
 0x186   :  { %1515 = vst.msk [vmem:[#allocation3 + $0x78] sm:$0xff] %vm115_vm1, %v1499_v63  ;;  %v1589_v39 = vld [vmem:[#allocation2 + $0x28] sm:$0xff]  ;;  %v1608_v1 = vadd.f32 %v1607_v22, %v1606_v28 }
 0x187   :  { %817 = vst.msk [vmem:[#allocation2 + $0x38] sm:$0xff] %vm115_vm1, %v800_v17  ;;  %v1609_v52 = vsel %vm115_vm1, %v1589_v39, 0.0 }
 0x188   :  { %v762_v3 = vpop.permute.xlu1 %761  ;;  %v1610_v63 = vadd.f32 %v1609_v52, %v1608_v1 }
 0x189   :  { %v801_v48 = vadd.f32 %v762_v3, %v625_v19  ;;  %v632_v19 = vld [vmem:[#allocation2 + $0x78] sm:$0xff] }
 0x18a   :  { %v1590_v60 = vld [vmem:[#allocation2 + $0x30] sm:$0xff] }
 0x18b   :  { %818 = vst.msk [vmem:[#allocation2 + $0x40] sm:$0xff] %vm115_vm1, %v801_v48  ;;  %v1611_v32 = vsel %vm115_vm1, %v1590_v60, 0.0 }
 0x18c   :  { %v764_v16 = vpop.permute.xlu0 %763  ;;  %v1612_v17 = vadd.f32 %v1611_v32, %v1610_v63 }
 0x18d   :  { %v802_v46 = vadd.f32 %v764_v16, %v626_v47  ;;  %v1655_v5 = vld [vmem:[#allocation3 + $0x78] sm:$0xff] }
 0x18e   :  { %v1685_v9 = vsel %vm115_vm1, %v1655_v5, 0.0  ;;  %v1591_v18 = vld [vmem:[#allocation2 + $0x38] sm:$0xff] }
 0x18f   :  { %819 = vst.msk [vmem:[#allocation2 + $0x48] sm:$0xff] %vm115_vm1, %v802_v46  ;;  %v1686_v14 = vadd.f32 %v1685_v9, %v1684_v53  ;;  %v1613_v35 = vsel %vm115_vm1, %v1591_v18, 0.0 }
 0x190   :  { %v766_v61 = vpop.permute.xlu1 %765  ;;  %v1614_v37 = vadd.f32 %v1613_v35, %v1612_v17 }
 0x191   :  { %v803_v21 = vadd.f32 %v766_v61, %v627_v23  ;;  %1687 = vadd.xlane.f32.xlu0 %v1686_v14 }
 0x192   :  { %v1592_v30 = vld [vmem:[#allocation2 + $0x40] sm:$0xff] }
 0x193   :  { %820 = vst.msk [vmem:[#allocation2 + $0x50] sm:$0xff] %vm115_vm1, %v803_v21  ;;  %v1615_v54 = vsel %vm115_vm1, %v1592_v30, 0.0 }
 0x194   :  { %v768_v8 = vpop.permute.xlu0 %767  ;;  %v1616_v15 = vadd.f32 %v1615_v54, %v1614_v37 }
 0x195   :  { %v804_v43 = vadd.f32 %v768_v8, %v628_v0  ;;  %1743 = vadd.xlane.f32.xlu0 %v1742_v38 }
 0x196   :  { %v1593_v50 = vld [vmem:[#allocation2 + $0x48] sm:$0xff] }
 0x197   :  { %821 = vst.msk [vmem:[#allocation2 + $0x58] sm:$0xff] %vm115_vm1, %v804_v43  ;;  %v1617_v56 = vsel %vm115_vm1, %v1593_v50, 0.0 }
 0x198   :  { %v1618_v27 = vadd.f32 %v1617_v56, %v1616_v15 }
 0x19a   :  { %v1594_v58 = vld [vmem:[#allocation2 + $0x50] sm:$0xff] }
 0x19b   :  { %v1619_v51 = vsel %vm115_vm1, %v1594_v58, 0.0 }
 0x19c   :  { %v1620_v40 = vadd.f32 %v1619_v51, %v1618_v27 }
 0x19e   :  { %v770_v36 = vpop.permute.xlu1 %769  ;;  %v1595_v3 = vld [vmem:[#allocation2 + $0x58] sm:$0xff] }
 0x19f   :  { %v805_v29 = vadd.f32 %v770_v36, %v629_v34  ;;  %v1621_v12 = vsel %vm115_vm1, %v1595_v3, 0.0 }
 0x1a0   :  { %v772_v24 = vpop.permute.xlu0 %771  ;;  %v1622_v46 = vadd.f32 %v1621_v12, %v1620_v40 }
 0x1a1   :  { %822 = vst.msk [vmem:[#allocation2 + $0x60] sm:$0xff] %vm115_vm1, %v805_v29  ;;  %v806_v20 = vadd.f32 %v772_v24, %v630_v42 }
 0x1a3   :  { %823 = vst.msk [vmem:[#allocation2 + $0x68] sm:$0xff] %vm115_vm1, %v806_v20 }
 0x1a8   :  { %v774_v33 = vpop.permute.xlu1 %773  ;;  %v1596_v47 = vld [vmem:[#allocation2 + $0x60] sm:$0xff] }
 0x1a9   :  { %v776_v11 = vpop.permute.xlu0 %775  ;;  %v807_v48 = vadd.f32 %v774_v33, %v631_v13  ;;  %v1623_v16 = vsel %vm115_vm1, %v1596_v47, 0.0 }
 0x1aa   :  { %v808_v6 = vadd.f32 %v776_v11, %v632_v19  ;;  %v1597_v25 = vld [vmem:[#allocation2 + $0x68] sm:$0xff]  ;;  %v1624_v53 = vadd.f32 %v1623_v16, %v1622_v46 }
 0x1ab   :  { %824 = vst.msk [vmem:[#allocation2 + $0x70] sm:$0xff] %vm115_vm1, %v807_v48  ;;  %v1625_v5 = vsel %vm115_vm1, %v1597_v25, 0.0 }
 0x1ac   :  { %825 = vst.msk [vmem:[#allocation2 + $0x78] sm:$0xff] %vm115_vm1, %v808_v6  ;;  %v1626_v9 = vadd.f32 %v1625_v5, %v1624_v53 }
 0x1b2   :  { %v1598_v31 = vld [vmem:[#allocation2 + $0x70] sm:$0xff] }
 0x1b3   :  { %v1599_v23 = vld [vmem:[#allocation2 + $0x78] sm:$0xff]  ;;  %v1627_v4 = vsel %vm115_vm1, %v1598_v31, 0.0 }
 0x1b4   :  { %v1629_v14 = vsel %vm115_vm1, %v1599_v23, 0.0  ;;  %v1628_v61 = vadd.f32 %v1627_v4, %v1626_v9  ;;  %vm1755_vm1 = vcmp.eq.s32.totalorder %v3596_v26, 1 }
 0x1b6   :  { %v1630_v21 = vadd.f32 %v1629_v14, %v1628_v61 }
 0x1b8   :  { %1631 = vadd.xlane.f32.xlu1 %v1630_v21 }
 0x21a   :  { %v1688_v38 = vpop.xlane.xlu0 %1687 }
 0x21b   :  { %v1689_v45 = vrot.slane %v1688_v38, 4 }
 0x21d   :  { %v1690_v57 = vadd.f32 %v1689_v45, %v1688_v38 }
 0x21e   :  { %v1744_v0 = vpop.xlane.xlu0 %1743 }
 0x21f   :  { %v1745_v8 = vrot.slane %v1744_v0, 4  ;;  %v1691_v43 = vrot.slane %v1690_v57, 2 }
 0x221   :  { %v1746_v2 = vadd.f32 %v1745_v8, %v1744_v0  ;;  %v1692_v62 = vadd.f32 %v1691_v43, %v1690_v57 }
 0x223   :  { %v1747_v44 = vrot.slane %v1746_v2, 2  ;;  %v1693_v55 = vrot.slane %v1692_v62, 1 }
 0x225   :  { %v1748_v10 = vadd.f32 %v1747_v44, %v1746_v2  ;;  %v1694_v28 = vadd.f32 %v1693_v55, %v1692_v62 }
 0x227   :  { %v1749_v22 = vrot.slane %v1748_v10, 1 }
 0x229   :  { %v1750_v36 = vadd.f32 %v1749_v22, %v1748_v10 }
 0x241   :  { %v1632_v41 = vpop.xlane.xlu1 %1631 }
 0x242   :  { %v1633_v59 = vrot.slane %v1632_v41, 4 }
 0x244   :  { %v1634_v49 = vadd.f32 %v1633_v59, %v1632_v41 }
 0x246   :  { %v1635_v7 = vrot.slane %v1634_v49, 2 }
 0x248   :  { %v1636_v39 = vadd.f32 %v1635_v7, %v1634_v49 }
 0x24a   :  { %v1637_v34 = vrot.slane %v1636_v39, 1 }
 0x24c   :  { %v1638_v60 = vadd.f32 %v1637_v34, %v1636_v39 }
 0x24e   :  { %1812 = vpush %v1638_v60 }
 0x24f   :  { %1814 = vpush %v1694_v28 }
 0x250   :  { %1816 = vpush %v1750_v36 }
 0x27f   :  { %s1813_s1 = spop %1812 }
 0x280   :  { %v1753_v42 = vstv %s1813_s1  ;;  %s1815_s30 = spop %1814 }
 0x281   :  { %v1754_v52 = vsel %vm1752_vm0, %v1753_v42, 0.0  ;;  %v1756_v29 = vstv %s1815_s30  ;;  %s1817_s4 = spop %1816 }
 0x282   :  { %v1757_v18 = vsel %vm1755_vm1, %v1756_v29, 0.0  ;;  %v1760_v1 = vstv %s1817_s4 }
 0x283   :  { %v1758_v24 = vadd.f32 %v1757_v18, %v1754_v52  ;;  %v1761_v32 = vsel %vm1759_vm6, %v1760_v1, 0.0 }
 0x285   :  { %v1762_v20 = vadd.f32 %v1761_v32, %v1758_v24 }
 0x287   :  { %1763 = vst [vmem:[#allocation5] sm:$0xff] %v1762_v20 }
 0x288   :  { %1978 = shalt.err (!%p1975_p4)
}
 0x289   :  { %1773 = dma.vmem_to_hbm [thread:$0]  %s1771_s6, 128, %s3488_s3, [#allocation6]  }
 0x28a   :  { %1987 = dma.done.wait [#allocation6], 128  }
 0x28b   :  { %1988 = vsyncadd [#allocation6], 4294967168 }
 0x28c   :  { %1777 = vsyncpa [#allocation6], 1 }

</bundles_post_ra>
